<compile_context>
chip_gen: v7x
topology: tpu7x:2x2x1
jax: 0.10.0
libtpu: 0.0.40
codegen_flags: <defaults>
</compile_context>

<pallas_src>
import functools

import jax
import jax.numpy as jnp
from jax import lax
from jax.experimental import pallas as pl
from jax.experimental.pallas import tpu as pltpu


def _classifier_kernel(x_ref, m_ref, wdw1_ref, wpw1_ref, wdw2_ref, wpw2_ref,
                       wcls_ref, bcls_ref, o_ref, *, H, W, images_per_step):
    # x_ref block: (C, X) with X = images_per_step * H * W (batch packed in lanes)
    # m_ref block: (4, X) precomputed border masks [col-1, col+1, row-1, row+1]
    # o_ref block: (Kp, X)
    C, X = x_ref.shape
    HW = H * W
    x = x_ref[...].astype(jnp.float32)

    cm = m_ref[0:1, :].astype(jnp.float32)   # source col-1 valid
    cp = m_ref[1:2, :].astype(jnp.float32)   # source col+1 valid
    rm = m_ref[2:3, :].astype(jnp.float32)   # source row-1 valid
    rp = m_ref[3:4, :].astype(jnp.float32)   # source row+1 valid

    def depthwise3x3(v, w):
        # v: (C, X); w: (C, 9) with tap t = ky*3 + kx  (oy = ky-1, ox = kx-1)
        # Column shifts first (2 rolls), then per-row weighted sums, then row
        # shifts (2 rolls): 4 XLU rolls per layer instead of 8.
        c_m1 = pltpu.roll(v, 1, axis=1) * cm            # v[q-1], col masked
        c_p1 = pltpu.roll(v, X - 1, axis=1) * cp        # v[q+1], col masked

        def srow(base):                                  # taps base..base+2
            return (c_m1 * w[:, base:base + 1]
                    + v * w[:, base + 1:base + 2]
                    + c_p1 * w[:, base + 2:base + 3])

        s_m1 = srow(0)                                   # oy = -1 row
        s_0 = srow(3)                                    # oy =  0 row
        s_p1 = srow(6)                                   # oy = +1 row
        t_m1 = pltpu.roll(s_m1, W, axis=1) * rm          # s[q-W], row masked
        t_p1 = pltpu.roll(s_p1, X - W, axis=1) * rp      # s[q+W], row masked
        return t_m1 + s_0 + t_p1

    def inst_norm_relu(v):
        # InstanceNorm2d: per-image, per-channel biased stats over HxW.
        # Single fused pass per image: stack [v ; v*v] on sublanes -> one
        # lane-reduce; var = E[x^2] - mean^2 (f32; matches ref at 1e-4).
        inv_n = 1.0 / HW
        outs = []
        for b in range(images_per_step):
            vb = v[:, b * HW:(b + 1) * HW]               # 128-aligned lane slice
            s = jnp.sum(jnp.concatenate([vb, vb * vb], axis=0),
                        axis=1, keepdims=True)           # (2C, 1)
            mean = s[:C] * inv_n
            var = s[C:] * inv_n - mean * mean
            outs.append(jnp.maximum((vb - mean) * lax.rsqrt(var + 1e-5), 0.0))
        return outs[0] if images_per_step == 1 else jnp.concatenate(outs, axis=1)

    def pointwise(v, w):
        # 1x1 conv: (Cout, Cin) @ (Cin, X); lane dim stays dense, N = B*HW.
        return jnp.dot(w, v, preferred_element_type=jnp.float32)

    # dsconv1
    y = inst_norm_relu(depthwise3x3(x, wdw1_ref[...]))
    y = inst_norm_relu(pointwise(y, wpw1_ref[...]))
    # dsconv2
    y = inst_norm_relu(depthwise3x3(y, wdw2_ref[...]))
    y = inst_norm_relu(pointwise(y, wpw2_ref[...]))
    # Dropout(0.1): identity at inference.  Final 1x1 conv with bias.
    out = pointwise(y, wcls_ref[...]) + bcls_ref[...]    # (Kp, X) + (Kp, 1)
    o_ref[...] = out.astype(o_ref.dtype)


def classifier_pallas(x_nchw, params, num_steps=None):
    """x_nchw: (N, C, H, W) (PyTorch layout, f32 or bf16). Returns (N, K, H, W)."""
    N, C, H, W = x_nchw.shape
    HW = H * W
    K = params["w_cls"].shape[0]
    Kp = ((K + 7) // 8) * 8                 # pad classifier rows -> unmasked stores

    if num_steps is None:
        # Fully collapse the grid (best on 1-TC v5e/v6e); keep an even grid when
        # there are enough images so v7x's two TensorCores both get work.
        num_steps = 2 if (N % 2 == 0 and N >= 4) else 1
    assert N % num_steps == 0
    bstep = N // num_steps
    X = bstep * HW                           # lanes per grid step (multiple of 128)

    # Channel-major lane packing (layout plumbing in the wrapper so the kernel
    # sees a lane-dense (C, B*HW) slab).
    x2 = x_nchw.transpose(1, 0, 2, 3).reshape(C, N * HW)

    # Border-validity masks, built once host-side.  Per-image row/col so roll
    # wrap across image boundaries inside the packed lane axis is masked out.
    pos = jnp.arange(X, dtype=jnp.int32)
    col = pos % W
    row = (pos // W) % H
    masks = jnp.stack([col >= 1, col <= W - 2,
                       row >= 1, row <= H - 2]).astype(jnp.float32)   # (4, X)

    w_cls, b_cls = params["w_cls"], params["b_cls"]
    if Kp != K:
        w_cls = jnp.pad(w_cls, ((0, Kp - K), (0, 0)))
        b_cls = jnp.pad(b_cls, ((0, Kp - K), (0, 0)))

    const = lambda shape: pl.BlockSpec(shape, lambda s: (0,) * len(shape))
    grid_spec = pltpu.PrefetchScalarGridSpec(
        num_scalar_prefetch=0,
        grid=(num_steps,),
        in_specs=[
            pl.BlockSpec((C, X), lambda s: (0, s)),   # packed activations
            const((4, X)),     # border masks
            const((C, 9)),     # depthwise 1 weights (C, tap)
            const((C, C)),     # pointwise 1 weights (Cout, Cin)
            const((C, 9)),     # depthwise 2 weights
            const((C, C)),     # pointwise 2 weights
            const((Kp, C)),    # classifier 1x1 weights (padded rows = 0)
            const((Kp, 1)),    # classifier bias (padded rows = 0)
        ],
        out_specs=pl.BlockSpec((Kp, X), lambda s: (0, s)),
    )
    out2 = pl.pallas_call(
        functools.partial(_classifier_kernel, H=H, W=W, images_per_step=bstep),
        out_shape=jax.ShapeDtypeStruct((Kp, N * HW), x_nchw.dtype),
        grid_spec=grid_spec,
        compiler_params=pltpu.CompilerParams(
            dimension_semantics=("parallel",)),        # steps are independent
    )(x2, masks, params["w_dw1"], params["w_pw1"], params["w_dw2"],
      params["w_pw2"], w_cls, b_cls)

    # Back to NCHW, drop the padded classifier rows.
    return out2.reshape(Kp, N, H, W).transpose(1, 0, 2, 3)[:, :K]


# ---------------- pure-JAX reference (for correctness check) ----------------
def _inst_norm_relu_ref(v):
    mean = jnp.mean(v, axis=(2, 3), keepdims=True)
    var = jnp.mean((v - mean) ** 2, axis=(2, 3), keepdims=True)
    return jnp.maximum((v - mean) * lax.rsqrt(var + 1e-5), 0.0)


def _dsconv_ref(x, w_dw_c9, w_pw):
    N, C, H, W = x.shape
    k = w_dw_c9.reshape(C, 3, 3).transpose(1, 2, 0)[:, :, None, :]  # HWIO, I/group=1
    y = lax.conv_general_dilated(
        x, k, window_strides=(1, 1), padding="SAME",
        dimension_numbers=("NCHW", "HWIO", "NCHW"), feature_group_count=C)
    y = _inst_norm_relu_ref(y)
    y = jnp.einsum("nchw,dc->ndhw", y, w_pw)
    return _inst_norm_relu_ref(y)


def classifier_ref(x_nchw, params):
    y = _dsconv_ref(x_nchw, params["w_dw1"], params["w_pw1"])
    y = _dsconv_ref(y, params["w_dw2"], params["w_pw2"])
    out = jnp.einsum("nchw,kc->nkhw", y, params["w_cls"])
    K = params["w_cls"].shape[0]
    return out + params["b_cls"].reshape(1, K, 1, 1)


# ----------------------------------------------------------------------------
def init_params(key, C, K):
    ks = jax.random.split(key, 6)
    # PyTorch weight shapes, then reshaped to kernel-friendly layouts.
    w_dw1 = jax.random.normal(ks[0], (C, 1, 3, 3), jnp.float32) * 0.2
    w_pw1 = jax.random.normal(ks[1], (C, C, 1, 1), jnp.float32) * 0.2
    w_dw2 = jax.random.normal(ks[2], (C, 1, 3, 3), jnp.float32) * 0.2
    w_pw2 = jax.random.normal(ks[3], (C, C, 1, 1), jnp.float32) * 0.2
    w_cls = jax.random.normal(ks[4], (K, C, 1, 1), jnp.float32) * 0.2
    b_cls = jax.random.normal(ks[5], (K,), jnp.float32) * 0.1
    return {
        "w_dw1": w_dw1.reshape(C, 9),          # (C, 9), tap = ky*3 + kx
        "w_pw1": w_pw1[:, :, 0, 0],            # (Cout, Cin)
        "w_dw2": w_dw2.reshape(C, 9),          # (C, 9)
        "w_pw2": w_pw2[:, :, 0, 0],            # (Cout, Cin)
        "w_cls": w_cls[:, :, 0, 0],            # (K, C)
        "b_cls": b_cls.reshape(K, 1),          # (K, 1)
    }


if __name__ == "__main__":
    N, C, H, W, K = 2, 8, 16, 16, 5
    key = jax.random.PRNGKey(0)
    kx, kp = jax.random.split(key)

    x_nchw = jax.random.normal(kx, (N, C, H, W), jnp.float32)  # PyTorch NCHW
    params = init_params(kp, C, K)

    out = jax.block_until_ready(classifier_pallas(x_nchw, params))
    ref = jax.block_until_ready(classifier_ref(x_nchw, params))

    assert out.shape == (N, K, H, W)
    assert jnp.allclose(out, ref, atol=1e-4, rtol=1e-4), (
        float(jnp.max(jnp.abs(out - ref))))

    print("KERNEL_OK")
</pallas_src>

<mosaic_0001>
module attributes {stable_mosaic.version = 11 : i64} {
  func.func @_classifier_kernel(%arg0: i32, %arg1: memref<8x512xf32, #tpu.memory_space<vmem>>, %arg2: memref<4x512xf32, #tpu.memory_space<vmem>>, %arg3: memref<8x9xf32, #tpu.memory_space<vmem>>, %arg4: memref<8x8xf32, #tpu.memory_space<vmem>>, %arg5: memref<8x9xf32, #tpu.memory_space<vmem>>, %arg6: memref<8x8xf32, #tpu.memory_space<vmem>>, %arg7: memref<8x8xf32, #tpu.memory_space<vmem>>, %arg8: memref<8x1xf32, #tpu.memory_space<vmem>>, %arg9: memref<8x512xf32, #tpu.memory_space<vmem>>) attributes {dimension_semantics = [#tpu.dimension_semantics<parallel>], iteration_bounds = array<i64: 1>, scalar_prefetch = 0 : i64, scratch_operands = 0 : i64, tpu.core_type = #tpu.core_type<tc>, window_params = [{transform_indices = @transform_0, window_bounds = array<i64: 8, 512>}, {pipeline_mode = #tpu.pipeline_mode<synchronous>, transform_indices = @transform_1, window_bounds = array<i64: 4, 512>}, {pipeline_mode = #tpu.pipeline_mode<synchronous>, transform_indices = @transform_2, window_bounds = array<i64: 8, 9>}, {pipeline_mode = #tpu.pipeline_mode<synchronous>, transform_indices = @transform_3, window_bounds = array<i64: 8, 8>}, {pipeline_mode = #tpu.pipeline_mode<synchronous>, transform_indices = @transform_4, window_bounds = array<i64: 8, 9>}, {pipeline_mode = #tpu.pipeline_mode<synchronous>, transform_indices = @transform_5, window_bounds = array<i64: 8, 8>}, {pipeline_mode = #tpu.pipeline_mode<synchronous>, transform_indices = @transform_6, window_bounds = array<i64: 8, 8>}, {pipeline_mode = #tpu.pipeline_mode<synchronous>, transform_indices = @transform_7, window_bounds = array<i64: 8, 1>}, {transform_indices = @transform_8, window_bounds = array<i64: 8, 512>}]} {
    %c0 = arith.constant 0 : index
    %c0_0 = arith.constant 0 : index
    %0 = vector.load %arg1[%c0, %c0_0] : memref<8x512xf32, #tpu.memory_space<vmem>>, vector<8x512xf32>
    %c0_1 = arith.constant 0 : index
    %c0_2 = arith.constant 0 : index
    %1 = vector.load %arg2[%c0_1, %c0_2] : memref<4x512xf32, #tpu.memory_space<vmem>>, vector<1x512xf32>
    %c1 = arith.constant 1 : index
    %c0_3 = arith.constant 0 : index
    %2 = vector.load %arg2[%c1, %c0_3] : memref<4x512xf32, #tpu.memory_space<vmem>>, vector<1x512xf32>
    %c2 = arith.constant 2 : index
    %c0_4 = arith.constant 0 : index
    %3 = vector.load %arg2[%c2, %c0_4] : memref<4x512xf32, #tpu.memory_space<vmem>>, vector<1x512xf32>
    %c3 = arith.constant 3 : index
    %c0_5 = arith.constant 0 : index
    %4 = vector.load %arg2[%c3, %c0_5] : memref<4x512xf32, #tpu.memory_space<vmem>>, vector<1x512xf32>
    %c0_6 = arith.constant 0 : index
    %c0_7 = arith.constant 0 : index
    %5 = vector.load %arg3[%c0_6, %c0_7] : memref<8x9xf32, #tpu.memory_space<vmem>>, vector<8x9xf32>
    %c1_i32 = arith.constant 1 : i32
    %6 = tpu.dynamic_rotate %0 by %c1_i32 dim 1 : vector<8x512xf32>, i32 -> vector<8x512xf32>
    %7 = vector.broadcast %1 : vector<1x512xf32> to vector<8x512xf32>
    %8 = arith.mulf %6, %7 : vector<8x512xf32>
    %c511_i32 = arith.constant 511 : i32
    %9 = tpu.dynamic_rotate %0 by %c511_i32 dim 1 : vector<8x512xf32>, i32 -> vector<8x512xf32>
    %10 = vector.broadcast %2 : vector<1x512xf32> to vector<8x512xf32>
    %11 = arith.mulf %9, %10 : vector<8x512xf32>
    %12 = vector.extract_strided_slice %5 {offsets = [0, 0], sizes = [8, 1], strides = [1, 1]} : vector<8x9xf32> to vector<8x1xf32>
    %13 = vector.broadcast %12 : vector<8x1xf32> to vector<8x512xf32>
    %14 = arith.mulf %8, %13 : vector<8x512xf32>
    %15 = vector.extract_strided_slice %5 {offsets = [0, 1], sizes = [8, 1], strides = [1, 1]} : vector<8x9xf32> to vector<8x1xf32>
    %16 = vector.broadcast %15 : vector<8x1xf32> to vector<8x512xf32>
    %17 = arith.mulf %0, %16 : vector<8x512xf32>
    %18 = arith.addf %14, %17 : vector<8x512xf32>
    %19 = vector.extract_strided_slice %5 {offsets = [0, 2], sizes = [8, 1], strides = [1, 1]} : vector<8x9xf32> to vector<8x1xf32>
    %20 = vector.broadcast %19 : vector<8x1xf32> to vector<8x512xf32>
    %21 = arith.mulf %11, %20 : vector<8x512xf32>
    %22 = arith.addf %18, %21 : vector<8x512xf32>
    %23 = vector.extract_strided_slice %5 {offsets = [0, 3], sizes = [8, 1], strides = [1, 1]} : vector<8x9xf32> to vector<8x1xf32>
    %24 = vector.broadcast %23 : vector<8x1xf32> to vector<8x512xf32>
    %25 = arith.mulf %8, %24 : vector<8x512xf32>
    %26 = vector.extract_strided_slice %5 {offsets = [0, 4], sizes = [8, 1], strides = [1, 1]} : vector<8x9xf32> to vector<8x1xf32>
    %27 = vector.broadcast %26 : vector<8x1xf32> to vector<8x512xf32>
    %28 = arith.mulf %0, %27 : vector<8x512xf32>
    %29 = arith.addf %25, %28 : vector<8x512xf32>
    %30 = vector.extract_strided_slice %5 {offsets = [0, 5], sizes = [8, 1], strides = [1, 1]} : vector<8x9xf32> to vector<8x1xf32>
    %31 = vector.broadcast %30 : vector<8x1xf32> to vector<8x512xf32>
    %32 = arith.mulf %11, %31 : vector<8x512xf32>
    %33 = arith.addf %29, %32 : vector<8x512xf32>
    %34 = vector.extract_strided_slice %5 {offsets = [0, 6], sizes = [8, 1], strides = [1, 1]} : vector<8x9xf32> to vector<8x1xf32>
    %35 = vector.broadcast %34 : vector<8x1xf32> to vector<8x512xf32>
    %36 = arith.mulf %8, %35 : vector<8x512xf32>
    %37 = vector.extract_strided_slice %5 {offsets = [0, 7], sizes = [8, 1], strides = [1, 1]} : vector<8x9xf32> to vector<8x1xf32>
    %38 = vector.broadcast %37 : vector<8x1xf32> to vector<8x512xf32>
    %39 = arith.mulf %0, %38 : vector<8x512xf32>
    %40 = arith.addf %36, %39 : vector<8x512xf32>
    %41 = vector.extract_strided_slice %5 {offsets = [0, 8], sizes = [8, 1], strides = [1, 1]} : vector<8x9xf32> to vector<8x1xf32>
    %42 = vector.broadcast %41 : vector<8x1xf32> to vector<8x512xf32>
    %43 = arith.mulf %11, %42 : vector<8x512xf32>
    %44 = arith.addf %40, %43 : vector<8x512xf32>
    %c16_i32 = arith.constant 16 : i32
    %45 = tpu.dynamic_rotate %22 by %c16_i32 dim 1 : vector<8x512xf32>, i32 -> vector<8x512xf32>
    %46 = vector.broadcast %3 : vector<1x512xf32> to vector<8x512xf32>
    %47 = arith.mulf %45, %46 : vector<8x512xf32>
    %c496_i32 = arith.constant 496 : i32
    %48 = tpu.dynamic_rotate %44 by %c496_i32 dim 1 : vector<8x512xf32>, i32 -> vector<8x512xf32>
    %49 = vector.broadcast %4 : vector<1x512xf32> to vector<8x512xf32>
    %50 = arith.mulf %48, %49 : vector<8x512xf32>
    %51 = arith.addf %47, %33 : vector<8x512xf32>
    %52 = arith.addf %51, %50 : vector<8x512xf32>
    %53 = vector.extract_strided_slice %52 {offsets = [0, 0], sizes = [8, 256], strides = [1, 1]} : vector<8x512xf32> to vector<8x256xf32>
    %54 = arith.mulf %53, %53 : vector<8x256xf32>
    %55 = tpu.concatenate %53, %54 in 0 : vector<8x256xf32>, vector<8x256xf32> -> vector<16x256xf32>
    %cst = arith.constant dense<0.000000e+00> : vector<16xf32>
    %56 = vector.multi_reduction <add>, %55, %cst [1] : vector<16x256xf32> to vector<16xf32>
    %57 = vector.shape_cast %56 : vector<16xf32> to vector<16x1xf32>
    %58 = vector.extract_strided_slice %57 {offsets = [0, 0], sizes = [8, 1], strides = [1, 1]} : vector<16x1xf32> to vector<8x1xf32>
    %cst_8 = arith.constant 3.906250e-03 : f32
    %59 = vector.broadcast %cst_8 : f32 to vector<8x1xf32>
    %60 = arith.mulf %58, %59 : vector<8x1xf32>
    %61 = vector.extract_strided_slice %57 {offsets = [8, 0], sizes = [8, 1], strides = [1, 1]} : vector<16x1xf32> to vector<8x1xf32>
    %cst_9 = arith.constant 3.906250e-03 : f32
    %62 = vector.broadcast %cst_9 : f32 to vector<8x1xf32>
    %63 = arith.mulf %61, %62 : vector<8x1xf32>
    %64 = arith.mulf %60, %60 : vector<8x1xf32>
    %65 = arith.subf %63, %64 : vector<8x1xf32>
    %66 = vector.broadcast %60 : vector<8x1xf32> to vector<8x256xf32>
    %67 = arith.subf %53, %66 : vector<8x256xf32>
    %cst_10 = arith.constant 9.99999974E-6 : f32
    %68 = vector.broadcast %cst_10 : f32 to vector<8x1xf32>
    %69 = arith.addf %65, %68 : vector<8x1xf32>
    %70 = math.rsqrt %69 : vector<8x1xf32>
    %71 = vector.broadcast %70 : vector<8x1xf32> to vector<8x256xf32>
    %72 = arith.mulf %67, %71 : vector<8x256xf32>
    %cst_11 = arith.constant 0.000000e+00 : f32
    %73 = vector.broadcast %cst_11 : f32 to vector<8x256xf32>
    %74 = arith.maximumf %72, %73 : vector<8x256xf32>
    %75 = vector.extract_strided_slice %52 {offsets = [0, 256], sizes = [8, 256], strides = [1, 1]} : vector<8x512xf32> to vector<8x256xf32>
    %76 = arith.mulf %75, %75 : vector<8x256xf32>
    %77 = tpu.concatenate %75, %76 in 0 : vector<8x256xf32>, vector<8x256xf32> -> vector<16x256xf32>
    %cst_12 = arith.constant dense<0.000000e+00> : vector<16xf32>
    %78 = vector.multi_reduction <add>, %77, %cst_12 [1] : vector<16x256xf32> to vector<16xf32>
    %79 = vector.shape_cast %78 : vector<16xf32> to vector<16x1xf32>
    %80 = vector.extract_strided_slice %79 {offsets = [0, 0], sizes = [8, 1], strides = [1, 1]} : vector<16x1xf32> to vector<8x1xf32>
    %cst_13 = arith.constant 3.906250e-03 : f32
    %81 = vector.broadcast %cst_13 : f32 to vector<8x1xf32>
    %82 = arith.mulf %80, %81 : vector<8x1xf32>
    %83 = vector.extract_strided_slice %79 {offsets = [8, 0], sizes = [8, 1], strides = [1, 1]} : vector<16x1xf32> to vector<8x1xf32>
    %cst_14 = arith.constant 3.906250e-03 : f32
    %84 = vector.broadcast %cst_14 : f32 to vector<8x1xf32>
    %85 = arith.mulf %83, %84 : vector<8x1xf32>
    %86 = arith.mulf %82, %82 : vector<8x1xf32>
    %87 = arith.subf %85, %86 : vector<8x1xf32>
    %88 = vector.broadcast %82 : vector<8x1xf32> to vector<8x256xf32>
    %89 = arith.subf %75, %88 : vector<8x256xf32>
    %cst_15 = arith.constant 9.99999974E-6 : f32
    %90 = vector.broadcast %cst_15 : f32 to vector<8x1xf32>
    %91 = arith.addf %87, %90 : vector<8x1xf32>
    %92 = math.rsqrt %91 : vector<8x1xf32>
    %93 = vector.broadcast %92 : vector<8x1xf32> to vector<8x256xf32>
    %94 = arith.mulf %89, %93 : vector<8x256xf32>
    %cst_16 = arith.constant 0.000000e+00 : f32
    %95 = vector.broadcast %cst_16 : f32 to vector<8x256xf32>
    %96 = arith.maximumf %94, %95 : vector<8x256xf32>
    %97 = tpu.concatenate %74, %96 in 1 : vector<8x256xf32>, vector<8x256xf32> -> vector<8x512xf32>
    %c0_17 = arith.constant 0 : index
    %c0_18 = arith.constant 0 : index
    %98 = vector.load %arg4[%c0_17, %c0_18] : memref<8x8xf32, #tpu.memory_space<vmem>>, vector<8x8xf32>
    %cst_19 = arith.constant dense<0.000000e+00> : vector<8x512xf32>
    %99 = tpu.matmul %98, %97, %cst_19 {dimension_numbers = #tpu.dot_dimension_numbers<[1], [0], [0], [1], [0, 0, 1, 1], [], []>} : vector<8x8xf32>, vector<8x512xf32>, vector<8x512xf32> -> vector<8x512xf32>
    %100 = vector.extract_strided_slice %99 {offsets = [0, 0], sizes = [8, 256], strides = [1, 1]} : vector<8x512xf32> to vector<8x256xf32>
    %101 = arith.mulf %100, %100 : vector<8x256xf32>
    %102 = tpu.concatenate %100, %101 in 0 : vector<8x256xf32>, vector<8x256xf32> -> vector<16x256xf32>
    %cst_20 = arith.constant dense<0.000000e+00> : vector<16xf32>
    %103 = vector.multi_reduction <add>, %102, %cst_20 [1] : vector<16x256xf32> to vector<16xf32>
    %104 = vector.shape_cast %103 : vector<16xf32> to vector<16x1xf32>
    %105 = vector.extract_strided_slice %104 {offsets = [0, 0], sizes = [8, 1], strides = [1, 1]} : vector<16x1xf32> to vector<8x1xf32>
    %cst_21 = arith.constant 3.906250e-03 : f32
    %106 = vector.broadcast %cst_21 : f32 to vector<8x1xf32>
    %107 = arith.mulf %105, %106 : vector<8x1xf32>
    %108 = vector.extract_strided_slice %104 {offsets = [8, 0], sizes = [8, 1], strides = [1, 1]} : vector<16x1xf32> to vector<8x1xf32>
    %cst_22 = arith.constant 3.906250e-03 : f32
    %109 = vector.broadcast %cst_22 : f32 to vector<8x1xf32>
    %110 = arith.mulf %108, %109 : vector<8x1xf32>
    %111 = arith.mulf %107, %107 : vector<8x1xf32>
    %112 = arith.subf %110, %111 : vector<8x1xf32>
    %113 = vector.broadcast %107 : vector<8x1xf32> to vector<8x256xf32>
    %114 = arith.subf %100, %113 : vector<8x256xf32>
    %cst_23 = arith.constant 9.99999974E-6 : f32
    %115 = vector.broadcast %cst_23 : f32 to vector<8x1xf32>
    %116 = arith.addf %112, %115 : vector<8x1xf32>
    %117 = math.rsqrt %116 : vector<8x1xf32>
    %118 = vector.broadcast %117 : vector<8x1xf32> to vector<8x256xf32>
    %119 = arith.mulf %114, %118 : vector<8x256xf32>
    %cst_24 = arith.constant 0.000000e+00 : f32
    %120 = vector.broadcast %cst_24 : f32 to vector<8x256xf32>
    %121 = arith.maximumf %119, %120 : vector<8x256xf32>
    %122 = vector.extract_strided_slice %99 {offsets = [0, 256], sizes = [8, 256], strides = [1, 1]} : vector<8x512xf32> to vector<8x256xf32>
    %123 = arith.mulf %122, %122 : vector<8x256xf32>
    %124 = tpu.concatenate %122, %123 in 0 : vector<8x256xf32>, vector<8x256xf32> -> vector<16x256xf32>
    %cst_25 = arith.constant dense<0.000000e+00> : vector<16xf32>
    %125 = vector.multi_reduction <add>, %124, %cst_25 [1] : vector<16x256xf32> to vector<16xf32>
    %126 = vector.shape_cast %125 : vector<16xf32> to vector<16x1xf32>
    %127 = vector.extract_strided_slice %126 {offsets = [0, 0], sizes = [8, 1], strides = [1, 1]} : vector<16x1xf32> to vector<8x1xf32>
    %cst_26 = arith.constant 3.906250e-03 : f32
    %128 = vector.broadcast %cst_26 : f32 to vector<8x1xf32>
    %129 = arith.mulf %127, %128 : vector<8x1xf32>
    %130 = vector.extract_strided_slice %126 {offsets = [8, 0], sizes = [8, 1], strides = [1, 1]} : vector<16x1xf32> to vector<8x1xf32>
    %cst_27 = arith.constant 3.906250e-03 : f32
    %131 = vector.broadcast %cst_27 : f32 to vector<8x1xf32>
    %132 = arith.mulf %130, %131 : vector<8x1xf32>
    %133 = arith.mulf %129, %129 : vector<8x1xf32>
    %134 = arith.subf %132, %133 : vector<8x1xf32>
    %135 = vector.broadcast %129 : vector<8x1xf32> to vector<8x256xf32>
    %136 = arith.subf %122, %135 : vector<8x256xf32>
    %cst_28 = arith.constant 9.99999974E-6 : f32
    %137 = vector.broadcast %cst_28 : f32 to vector<8x1xf32>
    %138 = arith.addf %134, %137 : vector<8x1xf32>
    %139 = math.rsqrt %138 : vector<8x1xf32>
    %140 = vector.broadcast %139 : vector<8x1xf32> to vector<8x256xf32>
    %141 = arith.mulf %136, %140 : vector<8x256xf32>
    %cst_29 = arith.constant 0.000000e+00 : f32
    %142 = vector.broadcast %cst_29 : f32 to vector<8x256xf32>
    %143 = arith.maximumf %141, %142 : vector<8x256xf32>
    %144 = tpu.concatenate %121, %143 in 1 : vector<8x256xf32>, vector<8x256xf32> -> vector<8x512xf32>
    %c0_30 = arith.constant 0 : index
    %c0_31 = arith.constant 0 : index
    %145 = vector.load %arg5[%c0_30, %c0_31] : memref<8x9xf32, #tpu.memory_space<vmem>>, vector<8x9xf32>
    %c1_i32_32 = arith.constant 1 : i32
    %146 = tpu.dynamic_rotate %144 by %c1_i32_32 dim 1 : vector<8x512xf32>, i32 -> vector<8x512xf32>
    %147 = vector.broadcast %1 : vector<1x512xf32> to vector<8x512xf32>
    %148 = arith.mulf %146, %147 : vector<8x512xf32>
    %c511_i32_33 = arith.constant 511 : i32
    %149 = tpu.dynamic_rotate %144 by %c511_i32_33 dim 1 : vector<8x512xf32>, i32 -> vector<8x512xf32>
    %150 = vector.broadcast %2 : vector<1x512xf32> to vector<8x512xf32>
    %151 = arith.mulf %149, %150 : vector<8x512xf32>
    %152 = vector.extract_strided_slice %145 {offsets = [0, 0], sizes = [8, 1], strides = [1, 1]} : vector<8x9xf32> to vector<8x1xf32>
    %153 = vector.broadcast %152 : vector<8x1xf32> to vector<8x512xf32>
    %154 = arith.mulf %148, %153 : vector<8x512xf32>
    %155 = vector.extract_strided_slice %145 {offsets = [0, 1], sizes = [8, 1], strides = [1, 1]} : vector<8x9xf32> to vector<8x1xf32>
    %156 = vector.broadcast %155 : vector<8x1xf32> to vector<8x512xf32>
    %157 = arith.mulf %144, %156 : vector<8x512xf32>
    %158 = arith.addf %154, %157 : vector<8x512xf32>
    %159 = vector.extract_strided_slice %145 {offsets = [0, 2], sizes = [8, 1], strides = [1, 1]} : vector<8x9xf32> to vector<8x1xf32>
    %160 = vector.broadcast %159 : vector<8x1xf32> to vector<8x512xf32>
    %161 = arith.mulf %151, %160 : vector<8x512xf32>
    %162 = arith.addf %158, %161 : vector<8x512xf32>
    %163 = vector.extract_strided_slice %145 {offsets = [0, 3], sizes = [8, 1], strides = [1, 1]} : vector<8x9xf32> to vector<8x1xf32>
    %164 = vector.broadcast %163 : vector<8x1xf32> to vector<8x512xf32>
    %165 = arith.mulf %148, %164 : vector<8x512xf32>
    %166 = vector.extract_strided_slice %145 {offsets = [0, 4], sizes = [8, 1], strides = [1, 1]} : vector<8x9xf32> to vector<8x1xf32>
    %167 = vector.broadcast %166 : vector<8x1xf32> to vector<8x512xf32>
    %168 = arith.mulf %144, %167 : vector<8x512xf32>
    %169 = arith.addf %165, %168 : vector<8x512xf32>
    %170 = vector.extract_strided_slice %145 {offsets = [0, 5], sizes = [8, 1], strides = [1, 1]} : vector<8x9xf32> to vector<8x1xf32>
    %171 = vector.broadcast %170 : vector<8x1xf32> to vector<8x512xf32>
    %172 = arith.mulf %151, %171 : vector<8x512xf32>
    %173 = arith.addf %169, %172 : vector<8x512xf32>
    %174 = vector.extract_strided_slice %145 {offsets = [0, 6], sizes = [8, 1], strides = [1, 1]} : vector<8x9xf32> to vector<8x1xf32>
    %175 = vector.broadcast %174 : vector<8x1xf32> to vector<8x512xf32>
    %176 = arith.mulf %148, %175 : vector<8x512xf32>
    %177 = vector.extract_strided_slice %145 {offsets = [0, 7], sizes = [8, 1], strides = [1, 1]} : vector<8x9xf32> to vector<8x1xf32>
    %178 = vector.broadcast %177 : vector<8x1xf32> to vector<8x512xf32>
    %179 = arith.mulf %144, %178 : vector<8x512xf32>
    %180 = arith.addf %176, %179 : vector<8x512xf32>
    %181 = vector.extract_strided_slice %145 {offsets = [0, 8], sizes = [8, 1], strides = [1, 1]} : vector<8x9xf32> to vector<8x1xf32>
    %182 = vector.broadcast %181 : vector<8x1xf32> to vector<8x512xf32>
    %183 = arith.mulf %151, %182 : vector<8x512xf32>
    %184 = arith.addf %180, %183 : vector<8x512xf32>
    %c16_i32_34 = arith.constant 16 : i32
    %185 = tpu.dynamic_rotate %162 by %c16_i32_34 dim 1 : vector<8x512xf32>, i32 -> vector<8x512xf32>
    %186 = vector.broadcast %3 : vector<1x512xf32> to vector<8x512xf32>
    %187 = arith.mulf %185, %186 : vector<8x512xf32>
    %c496_i32_35 = arith.constant 496 : i32
    %188 = tpu.dynamic_rotate %184 by %c496_i32_35 dim 1 : vector<8x512xf32>, i32 -> vector<8x512xf32>
    %189 = vector.broadcast %4 : vector<1x512xf32> to vector<8x512xf32>
    %190 = arith.mulf %188, %189 : vector<8x512xf32>
    %191 = arith.addf %187, %173 : vector<8x512xf32>
    %192 = arith.addf %191, %190 : vector<8x512xf32>
    %193 = vector.extract_strided_slice %192 {offsets = [0, 0], sizes = [8, 256], strides = [1, 1]} : vector<8x512xf32> to vector<8x256xf32>
    %194 = arith.mulf %193, %193 : vector<8x256xf32>
    %195 = tpu.concatenate %193, %194 in 0 : vector<8x256xf32>, vector<8x256xf32> -> vector<16x256xf32>
    %cst_36 = arith.constant dense<0.000000e+00> : vector<16xf32>
    %196 = vector.multi_reduction <add>, %195, %cst_36 [1] : vector<16x256xf32> to vector<16xf32>
    %197 = vector.shape_cast %196 : vector<16xf32> to vector<16x1xf32>
    %198 = vector.extract_strided_slice %197 {offsets = [0, 0], sizes = [8, 1], strides = [1, 1]} : vector<16x1xf32> to vector<8x1xf32>
    %cst_37 = arith.constant 3.906250e-03 : f32
    %199 = vector.broadcast %cst_37 : f32 to vector<8x1xf32>
    %200 = arith.mulf %198, %199 : vector<8x1xf32>
    %201 = vector.extract_strided_slice %197 {offsets = [8, 0], sizes = [8, 1], strides = [1, 1]} : vector<16x1xf32> to vector<8x1xf32>
    %cst_38 = arith.constant 3.906250e-03 : f32
    %202 = vector.broadcast %cst_38 : f32 to vector<8x1xf32>
    %203 = arith.mulf %201, %202 : vector<8x1xf32>
    %204 = arith.mulf %200, %200 : vector<8x1xf32>
    %205 = arith.subf %203, %204 : vector<8x1xf32>
    %206 = vector.broadcast %200 : vector<8x1xf32> to vector<8x256xf32>
    %207 = arith.subf %193, %206 : vector<8x256xf32>
    %cst_39 = arith.constant 9.99999974E-6 : f32
    %208 = vector.broadcast %cst_39 : f32 to vector<8x1xf32>
    %209 = arith.addf %205, %208 : vector<8x1xf32>
    %210 = math.rsqrt %209 : vector<8x1xf32>
    %211 = vector.broadcast %210 : vector<8x1xf32> to vector<8x256xf32>
    %212 = arith.mulf %207, %211 : vector<8x256xf32>
    %cst_40 = arith.constant 0.000000e+00 : f32
    %213 = vector.broadcast %cst_40 : f32 to vector<8x256xf32>
    %214 = arith.maximumf %212, %213 : vector<8x256xf32>
    %215 = vector.extract_strided_slice %192 {offsets = [0, 256], sizes = [8, 256], strides = [1, 1]} : vector<8x512xf32> to vector<8x256xf32>
    %216 = arith.mulf %215, %215 : vector<8x256xf32>
    %217 = tpu.concatenate %215, %216 in 0 : vector<8x256xf32>, vector<8x256xf32> -> vector<16x256xf32>
    %cst_41 = arith.constant dense<0.000000e+00> : vector<16xf32>
    %218 = vector.multi_reduction <add>, %217, %cst_41 [1] : vector<16x256xf32> to vector<16xf32>
    %219 = vector.shape_cast %218 : vector<16xf32> to vector<16x1xf32>
    %220 = vector.extract_strided_slice %219 {offsets = [0, 0], sizes = [8, 1], strides = [1, 1]} : vector<16x1xf32> to vector<8x1xf32>
    %cst_42 = arith.constant 3.906250e-03 : f32
    %221 = vector.broadcast %cst_42 : f32 to vector<8x1xf32>
    %222 = arith.mulf %220, %221 : vector<8x1xf32>
    %223 = vector.extract_strided_slice %219 {offsets = [8, 0], sizes = [8, 1], strides = [1, 1]} : vector<16x1xf32> to vector<8x1xf32>
    %cst_43 = arith.constant 3.906250e-03 : f32
    %224 = vector.broadcast %cst_43 : f32 to vector<8x1xf32>
    %225 = arith.mulf %223, %224 : vector<8x1xf32>
    %226 = arith.mulf %222, %222 : vector<8x1xf32>
    %227 = arith.subf %225, %226 : vector<8x1xf32>
    %228 = vector.broadcast %222 : vector<8x1xf32> to vector<8x256xf32>
    %229 = arith.subf %215, %228 : vector<8x256xf32>
    %cst_44 = arith.constant 9.99999974E-6 : f32
    %230 = vector.broadcast %cst_44 : f32 to vector<8x1xf32>
    %231 = arith.addf %227, %230 : vector<8x1xf32>
    %232 = math.rsqrt %231 : vector<8x1xf32>
    %233 = vector.broadcast %232 : vector<8x1xf32> to vector<8x256xf32>
    %234 = arith.mulf %229, %233 : vector<8x256xf32>
    %cst_45 = arith.constant 0.000000e+00 : f32
    %235 = vector.broadcast %cst_45 : f32 to vector<8x256xf32>
    %236 = arith.maximumf %234, %235 : vector<8x256xf32>
    %237 = tpu.concatenate %214, %236 in 1 : vector<8x256xf32>, vector<8x256xf32> -> vector<8x512xf32>
    %c0_46 = arith.constant 0 : index
    %c0_47 = arith.constant 0 : index
    %238 = vector.load %arg6[%c0_46, %c0_47] : memref<8x8xf32, #tpu.memory_space<vmem>>, vector<8x8xf32>
    %cst_48 = arith.constant dense<0.000000e+00> : vector<8x512xf32>
    %239 = tpu.matmul %238, %237, %cst_48 {dimension_numbers = #tpu.dot_dimension_numbers<[1], [0], [0], [1], [0, 0, 1, 1], [], []>} : vector<8x8xf32>, vector<8x512xf32>, vector<8x512xf32> -> vector<8x512xf32>
    %240 = vector.extract_strided_slice %239 {offsets = [0, 0], sizes = [8, 256], strides = [1, 1]} : vector<8x512xf32> to vector<8x256xf32>
    %241 = arith.mulf %240, %240 : vector<8x256xf32>
    %242 = tpu.concatenate %240, %241 in 0 : vector<8x256xf32>, vector<8x256xf32> -> vector<16x256xf32>
    %cst_49 = arith.constant dense<0.000000e+00> : vector<16xf32>
    %243 = vector.multi_reduction <add>, %242, %cst_49 [1] : vector<16x256xf32> to vector<16xf32>
    %244 = vector.shape_cast %243 : vector<16xf32> to vector<16x1xf32>
    %245 = vector.extract_strided_slice %244 {offsets = [0, 0], sizes = [8, 1], strides = [1, 1]} : vector<16x1xf32> to vector<8x1xf32>
    %cst_50 = arith.constant 3.906250e-03 : f32
    %246 = vector.broadcast %cst_50 : f32 to vector<8x1xf32>
    %247 = arith.mulf %245, %246 : vector<8x1xf32>
    %248 = vector.extract_strided_slice %244 {offsets = [8, 0], sizes = [8, 1], strides = [1, 1]} : vector<16x1xf32> to vector<8x1xf32>
    %cst_51 = arith.constant 3.906250e-03 : f32
    %249 = vector.broadcast %cst_51 : f32 to vector<8x1xf32>
    %250 = arith.mulf %248, %249 : vector<8x1xf32>
    %251 = arith.mulf %247, %247 : vector<8x1xf32>
    %252 = arith.subf %250, %251 : vector<8x1xf32>
    %253 = vector.broadcast %247 : vector<8x1xf32> to vector<8x256xf32>
    %254 = arith.subf %240, %253 : vector<8x256xf32>
    %cst_52 = arith.constant 9.99999974E-6 : f32
    %255 = vector.broadcast %cst_52 : f32 to vector<8x1xf32>
    %256 = arith.addf %252, %255 : vector<8x1xf32>
    %257 = math.rsqrt %256 : vector<8x1xf32>
    %258 = vector.broadcast %257 : vector<8x1xf32> to vector<8x256xf32>
    %259 = arith.mulf %254, %258 : vector<8x256xf32>
    %cst_53 = arith.constant 0.000000e+00 : f32
    %260 = vector.broadcast %cst_53 : f32 to vector<8x256xf32>
    %261 = arith.maximumf %259, %260 : vector<8x256xf32>
    %262 = vector.extract_strided_slice %239 {offsets = [0, 256], sizes = [8, 256], strides = [1, 1]} : vector<8x512xf32> to vector<8x256xf32>
    %263 = arith.mulf %262, %262 : vector<8x256xf32>
    %264 = tpu.concatenate %262, %263 in 0 : vector<8x256xf32>, vector<8x256xf32> -> vector<16x256xf32>
    %cst_54 = arith.constant dense<0.000000e+00> : vector<16xf32>
    %265 = vector.multi_reduction <add>, %264, %cst_54 [1] : vector<16x256xf32> to vector<16xf32>
    %266 = vector.shape_cast %265 : vector<16xf32> to vector<16x1xf32>
    %267 = vector.extract_strided_slice %266 {offsets = [0, 0], sizes = [8, 1], strides = [1, 1]} : vector<16x1xf32> to vector<8x1xf32>
    %cst_55 = arith.constant 3.906250e-03 : f32
    %268 = vector.broadcast %cst_55 : f32 to vector<8x1xf32>
    %269 = arith.mulf %267, %268 : vector<8x1xf32>
    %270 = vector.extract_strided_slice %266 {offsets = [8, 0], sizes = [8, 1], strides = [1, 1]} : vector<16x1xf32> to vector<8x1xf32>
    %cst_56 = arith.constant 3.906250e-03 : f32
    %271 = vector.broadcast %cst_56 : f32 to vector<8x1xf32>
    %272 = arith.mulf %270, %271 : vector<8x1xf32>
    %273 = arith.mulf %269, %269 : vector<8x1xf32>
    %274 = arith.subf %272, %273 : vector<8x1xf32>
    %275 = vector.broadcast %269 : vector<8x1xf32> to vector<8x256xf32>
    %276 = arith.subf %262, %275 : vector<8x256xf32>
    %cst_57 = arith.constant 9.99999974E-6 : f32
    %277 = vector.broadcast %cst_57 : f32 to vector<8x1xf32>
    %278 = arith.addf %274, %277 : vector<8x1xf32>
    %279 = math.rsqrt %278 : vector<8x1xf32>
    %280 = vector.broadcast %279 : vector<8x1xf32> to vector<8x256xf32>
    %281 = arith.mulf %276, %280 : vector<8x256xf32>
    %cst_58 = arith.constant 0.000000e+00 : f32
    %282 = vector.broadcast %cst_58 : f32 to vector<8x256xf32>
    %283 = arith.maximumf %281, %282 : vector<8x256xf32>
    %284 = tpu.concatenate %261, %283 in 1 : vector<8x256xf32>, vector<8x256xf32> -> vector<8x512xf32>
    %c0_59 = arith.constant 0 : index
    %c0_60 = arith.constant 0 : index
    %285 = vector.load %arg7[%c0_59, %c0_60] : memref<8x8xf32, #tpu.memory_space<vmem>>, vector<8x8xf32>
    %cst_61 = arith.constant dense<0.000000e+00> : vector<8x512xf32>
    %286 = tpu.matmul %285, %284, %cst_61 {dimension_numbers = #tpu.dot_dimension_numbers<[1], [0], [0], [1], [0, 0, 1, 1], [], []>} : vector<8x8xf32>, vector<8x512xf32>, vector<8x512xf32> -> vector<8x512xf32>
    %c0_62 = arith.constant 0 : index
    %c0_63 = arith.constant 0 : index
    %287 = vector.load %arg8[%c0_62, %c0_63] : memref<8x1xf32, #tpu.memory_space<vmem>>, vector<8x1xf32>
    %288 = vector.broadcast %287 : vector<8x1xf32> to vector<8x512xf32>
    %289 = arith.addf %286, %288 : vector<8x512xf32>
    %c0_64 = arith.constant 0 : index
    %c0_65 = arith.constant 0 : index
    %290 = vector.load %arg9[%c0_64, %c0_65] : memref<8x512xf32, #tpu.memory_space<vmem>>, vector<8x512xf32>
    tpu.vector_store %arg9[%c0_64, %c0_65], %289 {strides = array<i32>} : memref<8x512xf32, #tpu.memory_space<vmem>>, vector<8x512xf32>,
    return
  }
  func.func @transform_0(%arg0: i32) -> (i32, i32) {
    %c0_i32 = arith.constant 0 : i32
    %c0_i32_0 = arith.constant 0 : i32
    return %c0_i32, %arg0 : i32, i32
  }
  func.func @transform_1(%arg0: i32) -> (i32, i32) {
    %c0_i32 = arith.constant 0 : i32
    %c0_i32_0 = arith.constant 0 : i32
    %c0_i32_1 = arith.constant 0 : i32
    return %c0_i32, %c0_i32_0 : i32, i32
  }
  func.func @transform_2(%arg0: i32) -> (i32, i32) {
    %c0_i32 = arith.constant 0 : i32
    %c0_i32_0 = arith.constant 0 : i32
    %c0_i32_1 = arith.constant 0 : i32
    return %c0_i32, %c0_i32_0 : i32, i32
  }
  func.func @transform_3(%arg0: i32) -> (i32, i32) {
    %c0_i32 = arith.constant 0 : i32
    %c0_i32_0 = arith.constant 0 : i32
    %c0_i32_1 = arith.constant 0 : i32
    return %c0_i32, %c0_i32_0 : i32, i32
  }
  func.func @transform_4(%arg0: i32) -> (i32, i32) {
    %c0_i32 = arith.constant 0 : i32
    %c0_i32_0 = arith.constant 0 : i32
    %c0_i32_1 = arith.constant 0 : i32
    return %c0_i32, %c0_i32_0 : i32, i32
  }
  func.func @transform_5(%arg0: i32) -> (i32, i32) {
    %c0_i32 = arith.constant 0 : i32
    %c0_i32_0 = arith.constant 0 : i32
    %c0_i32_1 = arith.constant 0 : i32
    return %c0_i32, %c0_i32_0 : i32, i32
  }
  func.func @transform_6(%arg0: i32) -> (i32, i32) {
    %c0_i32 = arith.constant 0 : i32
    %c0_i32_0 = arith.constant 0 : i32
    %c0_i32_1 = arith.constant 0 : i32
    return %c0_i32, %c0_i32_0 : i32, i32
  }
  func.func @transform_7(%arg0: i32) -> (i32, i32) {
    %c0_i32 = arith.constant 0 : i32
    %c0_i32_0 = arith.constant 0 : i32
    %c0_i32_1 = arith.constant 0 : i32
    return %c0_i32, %c0_i32_0 : i32, i32
  }
  func.func @transform_8(%arg0: i32) -> (i32, i32) {
    %c0_i32 = arith.constant 0 : i32
    %c0_i32_0 = arith.constant 0 : i32
    return %c0_i32, %arg0 : i32, i32
  }
}

</mosaic_0001>

<bundles_post_ra>
// kernel: tpu_custom_call.1
= control target key start
LH: loop header
LB: loop body
LE: loop exit
PB: predicated region body
PF: predicated region fallthrough
CT: control target
= control target key end

     0   :  { %13 = vsyncpa [#allocation3], 0  ;;  %s1794_s0 = inlined_call_operand.hbm [shape: f32[8,512], index: 0, kind: input, shape index: {}]   ;;  %s1795_s1 = inlined_call_operand.hbm [shape: f32[4,512], index: 1, kind: input, shape index: {}]   ;;  %s1796_s2 = inlined_call_operand.vmem [shape: f32[8,9], index: 2, kind: input, shape index: {}]   ;;  %s1797_s3 = inlined_call_operand.vmem [shape: f32[8,8], index: 3, kind: input, shape index: {}]   ;;  %s1798_s4 = inlined_call_operand.vmem [shape: f32[8,9], index: 4, kind: input, shape index: {}]   ;;  %s1799_s5 = inlined_call_operand.hbm [shape: f32[8,8], index: 5, kind: input, shape index: {}]   ;;  %s1800_s6 = inlined_call_operand.hbm [shape: f32[8,8], index: 6, kind: input, shape index: {}]   ;;  %s1801_s7 = inlined_call_operand.vmem [shape: f32[8,1], index: 7, kind: input, shape index: {}]   ;;  %s1802_s8 = inlined_call_operand.hbm [shape: f32[8,512], index: 8, kind: output, shape index: {}]  }
   0x1   :  { %14 = vsyncpa [#allocation6], 0 }
   0x2   :  { %15 = vsyncpa [#allocation9], 0 }
   0x3   :  { %16 = vsyncpa [#allocation4], 0  ;;  %s1323_s27 = smov [#allocation5]   ;;  %s1324_s29 = smov [#allocation2]  }
   0x4   :  { %s33_s28 = sshll.u32 %s1323_s27, 4  ;;  %s23_s30 = sshll.u32 %s1324_s29, 4  ;;  %s34_s28 = int_to_ptr.vmem [resolvable:$true] %s33_s28  ;;  %s24_s30 = int_to_ptr.vmem [resolvable:$true] %s23_s30 }
   0x5   :  { %s1205_s11 = scalar_lea.hbm %s1795_s1, 256 }
   0x6   :  { %p1206_p0 = scmp.ne.s32.totalorder %s1795_s1, %s1205_s11  ;;  %p1209_p1 = scmp.lt.u32.totalorder %s1205_s11, %s1795_s1 }
   0x8   :  { %p1211_p2 = pnand %p1209_p1, %p1206_p0 }
   0xa   :  { %1214 = shalt.err (!%p1211_p2)
}
   0xb   :  { %s1215_s16 = scalar_lea.vmem %s34_s28, 256  ;;  %p1220_p4 = scmp.lt.s32.totalorder %s34_s28, %s34_s28 }
   0xc   :  { %p1216_p3 = scmp.ne.s32.totalorder %s34_s28, %s1215_s16  ;;  %p1221_p5 = scmp.lt.s32.totalorder %s1215_s16, %s1215_s16 }
   0xe   :  { %p1222_p6 = por %p1221_p5, %p1220_p4 }
  0x10   :  { %p1223_p7 = pnand %p1222_p6, %p1216_p3 }
  0x12   :  { %1226 = shalt.err (!%p1223_p7)
}
  0x13   :  { %36 = dma.hbm_to_vmem [thread:$0]  %s1795_s1, 256, %s34_s28, [#allocation6]  }
  0x14   :  { %s1227_s21 = scalar_lea.hbm %s1794_s0, 512 }
  0x15   :  { %p1228_p8 = scmp.ne.s32.totalorder %s1794_s0, %s1227_s21  ;;  %p1231_p9 = scmp.lt.u32.totalorder %s1227_s21, %s1794_s0 }
  0x17   :  { %p1233_p10 = pnand %p1231_p9, %p1228_p8 }
  0x19   :  { %1236 = shalt.err (!%p1233_p10)
}
  0x1a   :  { %s1237_s26 = scalar_lea.vmem %s24_s30, 512  ;;  %p1242_p12 = scmp.lt.s32.totalorder %s24_s30, %s24_s30 }
  0x1b   :  { %p1238_p11 = scmp.ne.s32.totalorder %s24_s30, %s1237_s26  ;;  %p1243_p13 = scmp.lt.s32.totalorder %s1237_s26, %s1237_s26 }
  0x1d   :  { %p1244_p0 = por %p1243_p13, %p1242_p12 }
  0x1f   :  { %p1245_p1 = pnand %p1244_p0, %p1238_p11 }
  0x21   :  { %1248 = shalt.err (!%p1245_p1)
}
  0x22   :  { %26 = dma.hbm_to_vmem [thread:$0]  %s1794_s0, 512, %s24_s30, [#allocation3]  }
  0x23   :  { %s1325_s28 = smov [#allocation7]   ;;  %s1326_s9 = smov [#allocation8]  }
  0x24   :  { %s49_s29 = sshll.u32 %s1325_s28, 4  ;;  %s59_s10 = sshll.u32 %s1326_s9, 4  ;;  %s50_s29 = int_to_ptr.vmem [resolvable:$true] %s49_s29  ;;  %s60_s10 = int_to_ptr.vmem [resolvable:$true] %s59_s10 }
  0x25   :  { %s1249_s13 = scalar_lea.hbm %s1799_s5, 128 }
  0x26   :  { %p1250_p2 = scmp.ne.s32.totalorder %s1799_s5, %s1249_s13  ;;  %p1253_p3 = scmp.lt.u32.totalorder %s1249_s13, %s1799_s5 }
  0x28   :  { %p1255_p4 = pnand %p1253_p3, %p1250_p2 }
  0x2a   :  { %1258 = shalt.err (!%p1255_p4)
}
  0x2b   :  { %s1259_s0 = scalar_lea.vmem %s50_s29, 128  ;;  %p1264_p6 = scmp.lt.s32.totalorder %s50_s29, %s50_s29 }
  0x2c   :  { %p1260_p5 = scmp.ne.s32.totalorder %s50_s29, %s1259_s0  ;;  %p1265_p7 = scmp.lt.s32.totalorder %s1259_s0, %s1259_s0 }
  0x2e   :  { %p1266_p8 = por %p1265_p7, %p1264_p6 }
  0x30   :  { %p1267_p9 = pnand %p1266_p8, %p1260_p5 }
  0x32   :  { %1270 = shalt.err (!%p1267_p9)
}
  0x33   :  { %52 = dma.hbm_to_vmem [thread:$0]  %s1799_s5, 128, %s50_s29, [#allocation6]  }
  0x34   :  { %s1271_s21 = scalar_lea.hbm %s1800_s6, 128 }
  0x35   :  { %p1272_p10 = scmp.ne.s32.totalorder %s1800_s6, %s1271_s21  ;;  %p1275_p11 = scmp.lt.u32.totalorder %s1271_s21, %s1800_s6 }
  0x37   :  { %p1277_p12 = pnand %p1275_p11, %p1272_p10 }
  0x39   :  { %1280 = shalt.err (!%p1277_p12)
}
  0x3a   :  { %s1281_s26 = scalar_lea.vmem %s60_s10, 128  ;;  %p1286_p0 = scmp.lt.s32.totalorder %s60_s10, %s60_s10 }
  0x3b   :  { %p1282_p13 = scmp.ne.s32.totalorder %s60_s10, %s1281_s26  ;;  %p1287_p1 = scmp.lt.s32.totalorder %s1281_s26, %s1281_s26 }
  0x3d   :  { %p1288_p2 = por %p1287_p1, %p1286_p0 }
  0x3f   :  { %p1289_p3 = pnand %p1288_p2, %p1282_p13 }
  0x41   :  { %1292 = shalt.err (!%p1289_p3)
}
  0x42   :  { %62 = dma.hbm_to_vmem [thread:$0]  %s1800_s6, 128, %s60_s10, [#allocation9]  }
  0x43   :  { %1315 = dma.done.wait [#allocation3], 512  }
  0x44   :  { %1316 = vsyncadd [#allocation3], 4294966784 }
  0x45   :  { %1317 = dma.done.wait [#allocation6], 384  }
  0x46   :  { %1318 = vsyncadd [#allocation6], 4294966912 }
  0x47   :  { %1319 = dma.done.wait [#allocation9], 128  }
  0x48   :  { %1320 = vsyncadd [#allocation9], 4294967168  ;;  %v1327_v0 = vmov 2   ;;  %v1328_v1 = vmov 0   ;;  %v88_v2 = vld [vmem:[%s1796_s2] sm:$0xff]  ;;  %v1329_v3 = vmov 6   ;;  %v97_v18 = vlaneseq }
  0x49   :  { %1171 = vset.pattern.permute.xlu1 %v1327_v0  ;;  %1169 = vset.pattern.permute.xlu0 %v1328_v1  ;;  %v1330_v4 = vmov 1   ;;  %v1441_v5 = vld [vmem:[#allocation2] sm:$0xff]  ;;  %v1331_v6 = vmov 7   ;;  %s1332_s6 = smov 1   ;;  %v1446_v7 = vld [vmem:[#allocation2 + $0x10] sm:$0xff]  ;;  %v1333_v8 = vmov 8  }
  0x4a   :  { %189 = vperm.xlu1 %1171, %v88_v2   ;;  %169 = vperm.xlu0 %1169, %v88_v2   ;;  %v1449_v9 = vld [vmem:[#allocation2 + $0x8] sm:$0xff]  ;;  %v1455_v10 = vld [vmem:[#allocation2 + $0x18] sm:$0xff]  ;;  %v1334_v11 = vmov 4   ;;  %s1335_s2 = smov 127   ;;  %v1336_v12 = vmov 3   ;;  %v1337_v13 = vmov 5  }
  0x4b   :  { %v106_v21 = vshrl.u32 %v97_v18, 7  ;;  %v1475_v22 = vand.u32 127, %v97_v18  ;;  %v81_v27 = vld [vmem:[#allocation5] ss:$4 sm:$0xf]  ;;  %s1338_s29 = smov 16  }
  0x4c   :  { %v83_v38 = vld [vmem:[#allocation5 + $0x1] ss:$4 sm:$0xf]  ;;  %s1339_s9 = smov 112   ;;  %vm389_vm4 = vcmask 64512  }
  0x4d   :  { %v1477_v24 = vsub.s32 1, %v106_v21  ;;  %v1479_v26 = vsub.s32 0, %v106_v21  ;;  %vm99_vm0 = vcmp.lt.s32.totalorder %v1475_v22, 1  ;;  %v1482_v28 = vsub.s32 2, %v106_v21 }
  0x4e   :  { %1172 = vset.pattern.permute.xlu1 %v1329_v3  ;;  %1170 = vset.pattern.permute.xlu0 %v1330_v4  ;;  %v1484_v29 = vsub.s32 3, %v106_v21  ;;  %vm137_vm1 = vcmp.lt.s32.totalorder %v1475_v22, 127  ;;  %vm272_vm2 = vcmp.lt.s32.totalorder %v1475_v22, 16  ;;  %vm310_vm3 = vcmp.lt.s32.totalorder %v1475_v22, 112 }
  0x4f   :  { %233 = vperm.xlu1 %1172, %v88_v2   ;;  %177 = vperm.xlu0 %1170, %v88_v2   ;;  %v1487_v30 = vrot.slane %v81_v27, %v1477_v24  ;;  %v1490_v31 = vrot.slane %v81_v27, %v1479_v26  ;;  %v1499_v36 = vrot.slane %v81_v27, %v1482_v28 }
  0x50   :  { %v1502_v37 = vrot.slane %v81_v27, %v1484_v29  ;;  %v1514_v44 = vrot.slane %v83_v38, %v1479_v26  ;;  %v1517_v45 = vrot.slane %v83_v38, %v1477_v24  ;;  %v1520_v46 = vrot.slane %v83_v38, %v1482_v28 }
  0x51   :  { %v1526_v50 = vrot.slane %v83_v38, %v1484_v29 }
  0x53   :  { %1173 = vset.pattern.permute.xlu1 %v1331_v6  ;;  %89 = vrot.lane.b32.xlu0 %v1441_v5, %s1332_s6 }
  0x54   :  { %241 = vperm.xlu1 %1173, %v88_v2   ;;  %1174 = vset.pattern.permute.xlu0 %v1333_v8 }
  0x57   :  { %93 = vrot.lane.b32.xlu0 %v1446_v7, %s1332_s6 }
  0x58   :  { %91 = vrot.lane.b32.xlu1 %v1449_v9, %s1332_s6 }
  0x59   :  { %1176 = vset.pattern.permute.xlu1 %v1334_v11 }
  0x5b   :  { %253 = vperm.xlu0 %1174, %v88_v2  }
  0x5c   :  { %95 = vrot.lane.b32.xlu1 %v1455_v10, %s1332_s6 }
  0x5f   :  { %133 = vrot.lane.b32.xlu0 %v1446_v7, %s1335_s2 }
  0x60   :  { %129 = vrot.lane.b32.xlu1 %v1441_v5, %s1335_s2  ;;  %1175 = vset.pattern.permute.xlu0 %v1336_v12 }
  0x63   :  { %201 = vperm.xlu0 %1175, %v88_v2  }
  0x64   :  { %131 = vrot.lane.b32.xlu1 %v1449_v9, %s1335_s2 }
  0x67   :  { %1179 = vset.pattern.permute.xlu0 %v1330_v4 }
  0x68   :  { %135 = vrot.lane.b32.xlu1 %v1455_v10, %s1335_s2 }
  0x6c   :  { %209 = vperm.xlu1 %1176, %v88_v2  }
  0x70   :  { %1177 = vset.pattern.permute.xlu1 %v1337_v13 }
  0x71   :  { %221 = vperm.xlu1 %1177, %v88_v2  }
  0x75   :  { %1178 = vset.pattern.permute.xlu1 %v1328_v1 }
  0xc9   :  { %v1471_v14 = vpop.permute.xlu1 %189  ;;  %v170_v15 = vpop.permute.xlu0 %169 }
  0xce   :  { %v1473_v16 = vpop.permute.xlu1 %233  ;;  %v178_v17 = vpop.permute.xlu0 %177 }
  0xcf   :  { %v180_v47 = vmul.f32 %v178_v17, %v1441_v5  ;;  %v181_v51 = vmul.f32 %v178_v17, %v1449_v9  ;;  %v182_v52 = vmul.f32 %v178_v17, %v1446_v7  ;;  %v183_v57 = vmul.f32 %v178_v17, %v1455_v10 }
  0xd2   :  { %v90_v19 = vpop.permute.xlu0 %89 }
  0xd3   :  { %v242_v20 = vpop.permute.xlu1 %241 }
  0xd4   :  { %v244_v58 = vmul.f32 %v242_v20, %v1441_v5  ;;  %v245_v61 = vmul.f32 %v242_v20, %v1449_v9  ;;  %v246_v62 = vmul.f32 %v242_v20, %v1446_v7  ;;  %v247_v4 = vmul.f32 %v242_v20, %v1455_v10 }
  0xd6   :  { %v94_v23 = vpop.permute.xlu0 %93 }
  0xd7   :  { %v92_v25 = vpop.permute.xlu1 %91 }
  0xd8   :  { %v102_v33 = vsel %vm99_vm0, %v90_v19, %v92_v25  ;;  %v101_v39 = vsel %vm99_vm0, %v92_v25, %v94_v23 }
  0xd9   :  { %v1507_v40 = vmul.f32 %v1487_v30, %v102_v33  ;;  %v127_v48 = vmul.f32 %v1499_v36, %v101_v39 }
  0xda   :  { %v1496_v35 = vpop.permute.xlu0 %253 }
  0xdb   :  { %v96_v32 = vpop.permute.xlu1 %95  ;;  %v173_v53 = vmul.f32 %v170_v15, %v1507_v40  ;;  %v174_v18 = vmul.f32 %v170_v15, %v127_v48  ;;  %v237_v17 = vmul.f32 %v1473_v16, %v1507_v40  ;;  %v238_v33 = vmul.f32 %v1473_v16, %v127_v48 }
  0xdc   :  { %v103_v34 = vsel %vm99_vm0, %v96_v32, %v90_v19  ;;  %v100_v41 = vsel %vm99_vm0, %v94_v23, %v96_v32 }
  0xdd   :  { %v125_v42 = vmul.f32 %v1490_v31, %v103_v34  ;;  %v128_v49 = vmul.f32 %v1502_v37, %v100_v41  ;;  %v185_v23 = vadd.f32 %v181_v51, %v173_v53 }
  0xde   :  { %v134_v55 = vpop.permute.xlu0 %133 }
  0xdf   :  { %v130_v43 = vpop.permute.xlu1 %129  ;;  %v172_v54 = vmul.f32 %v170_v15, %v125_v42  ;;  %v175_v19 = vmul.f32 %v170_v15, %v128_v49  ;;  %v236_v34 = vmul.f32 %v1473_v16, %v125_v42 }
  0xe1   :  { %v184_v27 = vadd.f32 %v180_v47, %v172_v54  ;;  %v187_v47 = vadd.f32 %v183_v57, %v175_v19  ;;  %v186_v54 = vadd.f32 %v182_v52, %v174_v18 }
  0xe2   :  { %v202_v53 = vpop.permute.xlu0 %201 }
  0xe3   :  { %v132_v56 = vpop.permute.xlu1 %131  ;;  %v204_v18 = vmul.f32 %v202_v53, %v125_v42 }
  0xe4   :  { %v139_v59 = vsel %vm137_vm1, %v132_v56, %v134_v55  ;;  %v140_v60 = vsel %vm137_vm1, %v130_v43, %v132_v56  ;;  %v249_v56 = vadd.f32 %v245_v61, %v237_v17 }
  0xe5   :  { %v163_v63 = vmul.f32 %v1514_v44, %v140_v60  ;;  %v164_v2 = vmul.f32 %v1517_v45, %v139_v59 }
  0xe7   :  { %v136_v21 = vpop.permute.xlu1 %135  ;;  %v193_v25 = vmul.f32 %v1471_v14, %v164_v2  ;;  %v192_v32 = vmul.f32 %v1471_v14, %v163_v63  ;;  %v257_v59 = vmul.f32 %v1496_v35, %v164_v2 }
  0xe8   :  { %v138_v38 = vsel %vm137_vm1, %v134_v55, %v136_v21  ;;  %v141_v20 = vsel %vm137_vm1, %v136_v21, %v130_v43  ;;  %v256_v21 = vmul.f32 %v1496_v35, %v163_v63 }
  0xe9   :  { %v165_v39 = vmul.f32 %v1520_v46, %v138_v38  ;;  %v166_v15 = vmul.f32 %v1526_v50, %v141_v20  ;;  %v197_v41 = vadd.f32 %v193_v25, %v185_v23  ;;  %v196_v51 = vadd.f32 %v192_v32, %v184_v27 }
  0xea   :  { %v239_v23 = vmul.f32 %v1473_v16, %v128_v49  ;;  %v248_v25 = vadd.f32 %v244_v58, %v236_v34  ;;  %v205_v27 = vmul.f32 %v202_v53, %v1507_v40  ;;  %v206_v32 = vmul.f32 %v202_v53, %v127_v48 }
  0xeb   :  { %v210_v60 = vpop.permute.xlu1 %209  ;;  %266 = vrot.lane.b32.xlu1 %v197_v41, %s1338_s29  ;;  %264 = vrot.lane.b32.xlu0 %v196_v51, %s1338_s29  ;;  %v195_v43 = vmul.f32 %v1471_v14, %v166_v15  ;;  %v194_v55 = vmul.f32 %v1471_v14, %v165_v39  ;;  %v207_v38 = vmul.f32 %v202_v53, %v128_v49 }
  0xec   :  { %v212_v57 = vmul.f32 %v210_v60, %v1441_v5  ;;  %v213_v52 = vmul.f32 %v210_v60, %v1449_v9  ;;  %v214_v61 = vmul.f32 %v210_v60, %v1446_v7  ;;  %v215_v14 = vmul.f32 %v210_v60, %v1455_v10 }
  0xed   :  { %v199_v17 = vadd.f32 %v195_v43, %v187_v47  ;;  %v198_v19 = vadd.f32 %v194_v55, %v186_v54  ;;  %v261_v16 = vadd.f32 %v257_v59, %v249_v56  ;;  %v260_v5 = vadd.f32 %v256_v21, %v248_v25 }
  0xee   :  { %v259_v9 = vmul.f32 %v1496_v35, %v166_v15  ;;  %v216_v20 = vadd.f32 %v212_v57, %v204_v18  ;;  %v217_v7 = vadd.f32 %v213_v52, %v205_v27  ;;  %v218_v42 = vadd.f32 %v214_v61, %v206_v32 }
  0xef   :  { %270 = vrot.lane.b32.xlu1 %v199_v17, %s1338_s29  ;;  %268 = vrot.lane.b32.xlu0 %v198_v19, %s1338_s29  ;;  %v258_v58 = vmul.f32 %v1496_v35, %v165_v39  ;;  %v219_v51 = vadd.f32 %v215_v14, %v207_v38  ;;  %v251_v10 = vadd.f32 %v247_v4, %v239_v23  ;;  %v87_v23 = vld [vmem:[#allocation5 + $0x3] ss:$4 sm:$0xf] }
  0xf0   :  { %v222_v41 = vpop.permute.xlu1 %221  ;;  %v250_v53 = vadd.f32 %v246_v62, %v238_v33  ;;  %v1599_v25 = vrot.slane %v87_v23, %v1479_v26 }
  0xf1   :  { %v224_v34 = vmul.f32 %v222_v41, %v163_v63  ;;  %v225_v40 = vmul.f32 %v222_v41, %v164_v2  ;;  %v226_v48 = vmul.f32 %v222_v41, %v165_v39  ;;  %v227_v49 = vmul.f32 %v222_v41, %v166_v15  ;;  %v85_v2 = vld [vmem:[#allocation5 + $0x2] ss:$4 sm:$0xf] }
  0xf2   :  { %v263_v60 = vadd.f32 %v259_v9, %v251_v10  ;;  %v262_v43 = vadd.f32 %v258_v58, %v250_v53  ;;  %v1576_v62 = vrot.slane %v85_v2, %v1477_v24  ;;  %v1579_v4 = vrot.slane %v85_v2, %v1479_v26 }
  0xf3   :  { %304 = vrot.lane.b32.xlu1 %v261_v16, %s1339_s9  ;;  %302 = vrot.lane.b32.xlu0 %v260_v5, %s1339_s9  ;;  %v229_v47 = vadd.f32 %v225_v40, %v217_v7  ;;  %v228_v54 = vadd.f32 %v224_v34, %v216_v20  ;;  %v230_v56 = vadd.f32 %v226_v48, %v218_v42 }
  0xf4   :  { %v231_v59 = vadd.f32 %v227_v49, %v219_v51  ;;  %v1586_v21 = vrot.slane %v85_v2, %v1482_v28  ;;  %v1589_v57 = vrot.slane %v85_v2, %v1484_v29  ;;  %v1606_v16 = vrot.slane %v87_v23, %v1484_v29 }
  0xf5   :  { %v1609_v5 = vrot.slane %v87_v23, %v1477_v24  ;;  %v1612_v9 = vrot.slane %v87_v23, %v1482_v28 }
  0xf7   :  { %308 = vrot.lane.b32.xlu1 %v263_v60, %s1339_s9  ;;  %306 = vrot.lane.b32.xlu0 %v262_v43, %s1339_s9 }
 0x15d   :  { %v267_v35 = vpop.permute.xlu1 %266  ;;  %v265_v63 = vpop.permute.xlu0 %264 }
 0x15e   :  { %v275_v15 = vsel %vm272_vm2, %v265_v63, %v267_v35 }
 0x15f   :  { %v299_v18 = vmul.f32 %v1576_v62, %v275_v15 }
 0x161   :  { %v271_v33 = vpop.permute.xlu1 %270  ;;  %v269_v39 = vpop.permute.xlu0 %268  ;;  %v341_v20 = vadd.f32 %v299_v18, %v229_v47 }
 0x162   :  { %v276_v55 = vsel %vm272_vm2, %v271_v33, %v265_v63  ;;  %v274_v52 = vsel %vm272_vm2, %v267_v35, %v269_v39  ;;  %v273_v61 = vsel %vm272_vm2, %v269_v39, %v271_v33  ;;  %v1340_v33 = vmov 0.0  }
 0x163   :  { %v298_v17 = vmul.f32 %v1579_v4, %v276_v55  ;;  %v300_v32 = vmul.f32 %v1586_v21, %v274_v52  ;;  %v301_v14 = vmul.f32 %v1589_v57, %v273_v61  ;;  %457 = vmatprep.mubr.f32.mxu0 %v1340_v33  ;;  %528 = vmatprep.mubr.f32.mxu1 %v1340_v33 }
 0x165   :  { %v305_v19 = vpop.permute.xlu1 %304  ;;  %v303_v27 = vpop.permute.xlu0 %302  ;;  %v340_v26 = vadd.f32 %v298_v17, %v228_v54  ;;  %v342_v58 = vadd.f32 %v300_v32, %v230_v56  ;;  %v343_v40 = vadd.f32 %v301_v14, %v231_v59 }
 0x166   :  { %v313_v38 = vsel %vm310_vm3, %v303_v27, %v305_v19 }
 0x167   :  { %v336_v7 = vmul.f32 %v1599_v25, %v313_v38 }
 0x169   :  { %v309_v42 = vpop.permute.xlu1 %308  ;;  %v307_v41 = vpop.permute.xlu0 %306  ;;  %v344_v51 = vadd.f32 %v340_v26, %v336_v7 }
 0x16a   :  { %v314_v34 = vsel %vm310_vm3, %v309_v42, %v303_v27  ;;  %v311_v29 = vsel %vm310_vm3, %v307_v41, %v309_v42  ;;  %v312_v24 = vsel %vm310_vm3, %v305_v19, %v307_v41 }
 0x16b   :  { %v339_v28 = vmul.f32 %v1606_v16, %v314_v34  ;;  %v337_v48 = vmul.f32 %v1609_v5, %v312_v24  ;;  %v338_v49 = vmul.f32 %v1612_v9, %v311_v29  ;;  %v348_v43 = vmul.f32 %v344_v51, %v344_v51 }
 0x16d   :  { %v347_v10 = vadd.f32 %v343_v40, %v339_v28  ;;  %v345_v53 = vadd.f32 %v341_v20, %v337_v48  ;;  %v346_v47 = vadd.f32 %v342_v58, %v338_v49  ;;  %v388_v48 = vld [vmem:[%s1797_s3] sm:$0xff] }
 0x16f   :  { %v350_v54 = vadd.f32 %v345_v53, %v344_v51  ;;  %v370_v56 = vadd.f32 %v347_v10, %v346_v47  ;;  %v349_v60 = vmul.f32 %v345_v53, %v345_v53  ;;  %v368_v63 = vmul.f32 %v346_v47, %v346_v47 }
 0x170   :  { %v369_v2 = vmul.f32 %v347_v10, %v347_v10 }
 0x171   :  { %351 = vadd.xlane.f32.xlu0 %v350_v54  ;;  %371 = vadd.xlane.f32.xlu1 %v370_v56  ;;  %v353_v35 = vadd.f32 %v349_v60, %v348_v43 }
 0x172   :  { %v373_v59 = vadd.f32 %v369_v2, %v368_v63 }
 0x175   :  { %354 = vadd.xlane.f32.xlu0 %v353_v35 }
 0x179   :  { %374 = vadd.xlane.f32.xlu0 %v373_v59 }
 0x1fe   :  { %v352_v39 = vpop.xlane.xlu0 %351  ;;  %v372_v55 = vpop.xlane.xlu1 %371 }
 0x1ff   :  { %v356_v15 = vmul.f32 0.00390625, %v352_v39  ;;  %v376_v52 = vmul.f32 0.00390625, %v372_v55 }
 0x201   :  { %v358_v61 = vmul.f32 %v356_v15, %v356_v15  ;;  %v378_v32 = vmul.f32 %v376_v52, %v376_v52  ;;  %v361_v26 = vsub.f32 %v345_v53, %v356_v15  ;;  %v360_v7 = vsub.f32 %v344_v51, %v356_v15 }
 0x202   :  { %v355_v23 = vpop.xlane.xlu0 %354  ;;  %v381_v24 = vsub.f32 %v347_v10, %v376_v52  ;;  %v380_v40 = vsub.f32 %v346_v47, %v376_v52 }
 0x203   :  { %v357_v18 = vmul.f32 0.00390625, %v355_v23  ;;  %v575_v23 = vld [vmem:[%s1798_s4] sm:$0xff] }
 0x205   :  { %v359_v17 = vsub.f32 %v357_v18, %v358_v61 }
 0x206   :  { %v375_v19 = vpop.xlane.xlu0 %374 }
 0x207   :  { %v362_v27 = vadd.f32 1e-05, %v359_v17  ;;  %v377_v38 = vmul.f32 0.00390625, %v375_v19 }
 0x209   :  { %1189 = vrsqrt.f32 %v362_v27  ;;  %v379_v14 = vsub.f32 %v377_v38, %v378_v32 }
 0x20b   :  { %v382_v20 = vadd.f32 1e-05, %v379_v14 }
 0x20d   :  { %1191 = vrsqrt.f32 %v382_v20 }
 0x213   :  { %v1190_v42 = vpop.eup %1189 }
 0x214   :  { %v365_v41 = vmul.f32 %v1190_v42, %v361_v26  ;;  %v364_v58 = vmul.f32 %v1190_v42, %v360_v7 }
 0x216   :  { %v367_v34 = vmax.f32 %v365_v41, 0.0  ;;  %v366_v29 = vmax.f32 %v364_v58, 0.0 }
 0x217   :  { %v1192_v28 = vpop.eup %1191 }
 0x218   :  { %393 = vmatprep.subr.mxu0 %v367_v34  ;;  %v385_v49 = vmul.f32 %v1192_v28, %v381_v24  ;;  %v384_v54 = vmul.f32 %v1192_v28, %v380_v40 }
 0x219   :  { %394 = vmatpush1.msra.mxu0 %v366_v29 }
 0x21a   :  { %1144 = vmatmul.mubr.msk.f32.vlgmr.msra.gmra.mrb[0].mxu0 %vm389_vm4, %v388_v48  ;;  %v387_v51 = vmax.f32 %v385_v49, 0.0  ;;  %v386_v53 = vmax.f32 %v384_v54, 0.0 }
 0x21b   :  { %853 = vmatprep.mubr.f32.mxu0 %v1340_v33 }
 0x21c   :  { %464 = vmatprep.subr.mxu1 %v387_v51 }
 0x21d   :  { %465 = vmatpush1.msra.mxu1 %v386_v53 }
 0x21e   :  { %1145 = vmatmul.mubr.msk.f32.vlgmr.msra.gmra.mrb[0].mxu1 %vm389_vm4, %v388_v48 }
 0x21f   :  { %924 = vmatprep.mubr.f32.mxu1 %v1340_v33 }
 0x2ed   :  { %v459_v10 = vpop.f32.mrb[0].mxu0 }
 0x2ee   :  { %v461_v47 = vpop.f32.mrb[1].mxu0  ;;  %v535_v56 = vmul.f32 %v459_v10, %v459_v10 }
 0x2ef   :  { %v537_v60 = vadd.f32 %v461_v47, %v459_v10  ;;  %v536_v43 = vmul.f32 %v461_v47, %v461_v47 }
 0x2f1   :  { %538 = vadd.xlane.f32.xlu1 %v537_v60  ;;  %v530_v35 = vpop.f32.mrb[0].mxu1  ;;  %v540_v63 = vadd.f32 %v536_v43, %v535_v56 }
 0x2f2   :  { %v532_v2 = vpop.f32.mrb[1].mxu1  ;;  %v555_v59 = vmul.f32 %v530_v35, %v530_v35 }
 0x2f3   :  { %v557_v39 = vadd.f32 %v532_v2, %v530_v35  ;;  %v556_v15 = vmul.f32 %v532_v2, %v532_v2 }
 0x2f5   :  { %541 = vadd.xlane.f32.xlu1 %v540_v63  ;;  %558 = vadd.xlane.f32.xlu0 %v557_v39  ;;  %v560_v55 = vadd.f32 %v556_v15, %v555_v59 }
 0x2f9   :  { %561 = vadd.xlane.f32.xlu0 %v560_v55 }
 0x306   :  { %610 = vperm.xlu1 %1178, %v575_v23  }
 0x30a   :  { %1180 = vset.pattern.permute.xlu1 %v1327_v0 }
 0x30b   :  { %630 = vperm.xlu1 %1180, %v575_v23  }
 0x30f   :  { %1181 = vset.pattern.permute.xlu1 %v1329_v3  ;;  %618 = vperm.xlu0 %1179, %v575_v23  }
 0x310   :  { %674 = vperm.xlu1 %1181, %v575_v23  }
 0x313   :  { %1184 = vset.pattern.permute.xlu0 %v1336_v12 }
 0x314   :  { %1182 = vset.pattern.permute.xlu1 %v1331_v6 }
 0x315   :  { %682 = vperm.xlu1 %1182, %v575_v23  }
 0x319   :  { %1183 = vset.pattern.permute.xlu1 %v1333_v8 }
 0x31a   :  { %694 = vperm.xlu1 %1183, %v575_v23  }
 0x31e   :  { %1185 = vset.pattern.permute.xlu1 %v1334_v11 }
 0x37e   :  { %v539_v52 = vpop.xlane.xlu1 %538 }
 0x37f   :  { %v543_v61 = vmul.f32 0.00390625, %v539_v52 }
 0x381   :  { %v545_v0 = vmul.f32 %v543_v61, %v543_v61  ;;  %v547_v8 = vsub.f32 %v459_v10, %v543_v61  ;;  %v548_v7 = vsub.f32 %v461_v47, %v543_v61 }
 0x382   :  { %v542_v18 = vpop.xlane.xlu1 %541  ;;  %v559_v17 = vpop.xlane.xlu0 %558 }
 0x383   :  { %v544_v19 = vmul.f32 0.00390625, %v542_v18  ;;  %v563_v27 = vmul.f32 0.00390625, %v559_v17 }
 0x385   :  { %v546_v3 = vsub.f32 %v544_v19, %v545_v0  ;;  %v565_v32 = vmul.f32 %v563_v27, %v563_v27  ;;  %v567_v58 = vsub.f32 %v530_v35, %v563_v27  ;;  %v568_v28 = vsub.f32 %v532_v2, %v563_v27 }
 0x386   :  { %v562_v38 = vpop.xlane.xlu0 %561  ;;  %v611_v54 = vpop.permute.xlu1 %610 }
 0x387   :  { %v549_v14 = vadd.f32 1e-05, %v546_v3  ;;  %v564_v12 = vmul.f32 0.00390625, %v562_v38 }
 0x389   :  { %1193 = vrsqrt.f32 %v549_v14  ;;  %v566_v6 = vsub.f32 %v564_v12, %v565_v32 }
 0x38a   :  { %v631_v51 = vpop.permute.xlu1 %630 }
 0x38b   :  { %v569_v20 = vadd.f32 1e-05, %v566_v6 }
 0x38d   :  { %1195 = vrsqrt.f32 %v569_v20 }
 0x38e   :  { %v619_v43 = vpop.permute.xlu0 %618 }
 0x38f   :  { %v675_v53 = vpop.permute.xlu1 %674 }
 0x393   :  { %v1194_v26 = vpop.eup %1193 }
 0x394   :  { %v551_v11 = vmul.f32 %v1194_v26, %v547_v8  ;;  %v552_v42 = vmul.f32 %v1194_v26, %v548_v7  ;;  %v683_v10 = vpop.permute.xlu1 %682 }
 0x396   :  { %v1642_v41 = vmax.f32 %v551_v11, 0.0  ;;  %v1648_v24 = vmax.f32 %v552_v42, 0.0 }
 0x397   :  { %v1196_v34 = vpop.eup %1195 }
 0x398   :  { %v571_v29 = vmul.f32 %v1196_v34, %v567_v58  ;;  %576 = vrot.lane.b32.xlu1 %v1642_v41, %s1332_s6  ;;  %592 = vrot.lane.b32.xlu0 %v1642_v41, %s1335_s2  ;;  %v572_v48 = vmul.f32 %v1196_v34, %v568_v28  ;;  %v622_v0 = vmul.f32 %v619_v43, %v1648_v24 }
 0x399   :  { %v1669_v47 = vpop.permute.xlu1 %694  ;;  %v621_v27 = vmul.f32 %v619_v43, %v1642_v41 }
 0x39a   :  { %v1650_v40 = vmax.f32 %v571_v29, 0.0  ;;  %v1658_v49 = vmax.f32 %v572_v48, 0.0 }
 0x39c   :  { %578 = vrot.lane.b32.xlu1 %v1648_v24, %s1332_s6  ;;  %596 = vrot.lane.b32.xlu0 %v1650_v40, %s1335_s2  ;;  %v623_v8 = vmul.f32 %v619_v43, %v1650_v40  ;;  %v624_v26 = vmul.f32 %v619_v43, %v1658_v49 }
 0x3a0   :  { %580 = vrot.lane.b32.xlu1 %v1650_v40, %s1332_s6  ;;  %642 = vperm.xlu0 %1184, %v575_v23  }
 0x3a4   :  { %582 = vrot.lane.b32.xlu1 %v1658_v49, %s1332_s6  ;;  %1188 = vset.pattern.permute.xlu0 %v1328_v1 }
 0x3a8   :  { %594 = vrot.lane.b32.xlu1 %v1648_v24, %s1335_s2 }
 0x3ac   :  { %598 = vrot.lane.b32.xlu1 %v1658_v49, %s1335_s2 }
 0x3b0   :  { %650 = vperm.xlu1 %1185, %v575_v23  }
 0x3b4   :  { %1186 = vset.pattern.permute.xlu1 %v1337_v13 }
 0x3b5   :  { %662 = vperm.xlu1 %1186, %v575_v23  }
 0x3b9   :  { %1187 = vset.pattern.permute.xlu1 %v1328_v1 }
 0x40a   :  { %v577_v56 = vpop.permute.xlu1 %576  ;;  %v593_v2 = vpop.permute.xlu0 %592 }
 0x40e   :  { %v579_v60 = vpop.permute.xlu1 %578 }
 0x40f   :  { %v586_v35 = vsel %vm99_vm0, %v577_v56, %v579_v60 }
 0x410   :  { %v1674_v59 = vmul.f32 %v586_v35, %v1487_v30  ;;  %v597_v30 = vpop.permute.xlu0 %596 }
 0x412   :  { %v581_v63 = vpop.permute.xlu1 %580  ;;  %v614_v23 = vmul.f32 %v611_v54, %v1674_v59  ;;  %v678_v34 = vmul.f32 %v675_v53, %v1674_v59 }
 0x413   :  { %v585_v1 = vsel %vm99_vm0, %v579_v60, %v581_v63  ;;  %v685_v60 = vmul.f32 %v683_v10, %v1642_v41 }
 0x414   :  { %v1687_v52 = vmul.f32 %v585_v1, %v1499_v36  ;;  %v626_v32 = vadd.f32 %v622_v0, %v614_v23 }
 0x416   :  { %v583_v13 = vpop.permute.xlu1 %582  ;;  %v679_v1 = vmul.f32 %v675_v53, %v1687_v52 }
 0x417   :  { %v584_v39 = vsel %vm99_vm0, %v581_v63, %v583_v13  ;;  %v587_v15 = vsel %vm99_vm0, %v583_v13, %v577_v56 }
 0x418   :  { %v1683_v55 = vmul.f32 %v587_v15, %v1490_v31  ;;  %v1690_v61 = vmul.f32 %v584_v39, %v1502_v37  ;;  %v615_v37 = vmul.f32 %v611_v54, %v1687_v52  ;;  %v687_v39 = vmul.f32 %v683_v10, %v1650_v40 }
 0x419   :  { %v688_v15 = vmul.f32 %v683_v10, %v1658_v49 }
 0x41a   :  { %v613_v18 = vmul.f32 %v611_v54, %v1683_v55  ;;  %v595_v17 = vpop.permute.xlu1 %594  ;;  %v616_v38 = vmul.f32 %v611_v54, %v1690_v61  ;;  %v677_v29 = vmul.f32 %v675_v53, %v1683_v55  ;;  %v627_v28 = vadd.f32 %v623_v8, %v615_v37 }
 0x41b   :  { %v601_v19 = vsel %vm137_vm1, %v595_v17, %v597_v30  ;;  %v602_v31 = vsel %vm137_vm1, %v593_v2, %v595_v17  ;;  %v680_v13 = vmul.f32 %v675_v53, %v1690_v61  ;;  %v691_v0 = vadd.f32 %v687_v39, %v679_v1 }
 0x41c   :  { %v1700_v36 = vmul.f32 %v602_v31, %v1514_v44  ;;  %v1703_v3 = vmul.f32 %v601_v19, %v1517_v45  ;;  %v625_v12 = vadd.f32 %v621_v27, %v613_v18  ;;  %v628_v48 = vadd.f32 %v624_v26, %v616_v38 }
 0x41d   :  { %v692_v53 = vadd.f32 %v688_v15, %v680_v13 }
 0x41e   :  { %v599_v14 = vpop.permute.xlu1 %598  ;;  %v633_v6 = vmul.f32 %v631_v51, %v1700_v36  ;;  %v634_v20 = vmul.f32 %v631_v51, %v1703_v3  ;;  %v698_v35 = vmul.f32 %v1669_v47, %v1703_v3  ;;  %v697_v63 = vmul.f32 %v1669_v47, %v1700_v36 }
 0x41f   :  { %v600_v44 = vsel %vm137_vm1, %v597_v30, %v599_v14  ;;  %v603_v45 = vsel %vm137_vm1, %v599_v14, %v593_v2  ;;  %v643_v27 = vpop.permute.xlu0 %642 }
 0x420   :  { %v606_v7 = vmul.f32 %v600_v44, %v1520_v46  ;;  %v607_v11 = vmul.f32 %v603_v45, %v1526_v50  ;;  %v637_v42 = vadd.f32 %v633_v6, %v625_v12  ;;  %v638_v58 = vadd.f32 %v634_v20, %v626_v32 }
 0x421   :  { %v686_v46 = vmul.f32 %v683_v10, %v1648_v24  ;;  %v645_v14 = vmul.f32 %v643_v27, %v1683_v55  ;;  %v646_v12 = vmul.f32 %v643_v27, %v1674_v59  ;;  %v647_v6 = vmul.f32 %v643_v27, %v1687_v52 }
 0x422   :  { %705 = vrot.lane.b32.xlu0 %v637_v42, %s1338_s29  ;;  %707 = vrot.lane.b32.xlu1 %v638_v58, %s1338_s29  ;;  %v636_v54 = vmul.f32 %v631_v51, %v607_v11  ;;  %v635_v56 = vmul.f32 %v631_v51, %v606_v7  ;;  %v689_v51 = vadd.f32 %v685_v60, %v677_v29 }
 0x423   :  { %v690_v2 = vadd.f32 %v686_v46, %v678_v34  ;;  %v700_v18 = vmul.f32 %v1669_v47, %v607_v11  ;;  %v699_v17 = vmul.f32 %v1669_v47, %v606_v7  ;;  %v648_v20 = vmul.f32 %v643_v27, %v1690_v61 }
 0x424   :  { %v640_v43 = vadd.f32 %v636_v54, %v628_v48  ;;  %v639_v50 = vadd.f32 %v635_v56, %v627_v28  ;;  %v701_v30 = vadd.f32 %v697_v63, %v689_v51 }
 0x425   :  { %v702_v23 = vadd.f32 %v698_v35, %v690_v2  ;;  %v704_v19 = vadd.f32 %v700_v18, %v692_v53  ;;  %v703_v31 = vadd.f32 %v699_v17, %v691_v0 }
 0x426   :  { %711 = vrot.lane.b32.xlu1 %v640_v43, %s1338_s29  ;;  %709 = vrot.lane.b32.xlu0 %v639_v50, %s1338_s29 }
 0x42a   :  { %723 = vrot.lane.b32.xlu1 %v702_v23, %s1339_s9  ;;  %721 = vrot.lane.b32.xlu0 %v701_v30, %s1339_s9 }
 0x42e   :  { %727 = vrot.lane.b32.xlu1 %v704_v19, %s1339_s9  ;;  %725 = vrot.lane.b32.xlu0 %v703_v31, %s1339_s9 }
 0x42f   :  { %v651_v10 = vpop.permute.xlu1 %650 }
 0x430   :  { %v653_v37 = vmul.f32 %v651_v10, %v1642_v41  ;;  %v654_v32 = vmul.f32 %v651_v10, %v1648_v24  ;;  %v655_v47 = vmul.f32 %v651_v10, %v1650_v40  ;;  %v656_v38 = vmul.f32 %v651_v10, %v1658_v49 }
 0x432   :  { %v657_v8 = vadd.f32 %v653_v37, %v645_v14  ;;  %v658_v26 = vadd.f32 %v654_v32, %v646_v12  ;;  %v659_v44 = vadd.f32 %v655_v47, %v647_v6  ;;  %v660_v45 = vadd.f32 %v656_v38, %v648_v20 }
 0x434   :  { %v663_v42 = vpop.permute.xlu1 %662 }
 0x435   :  { %v665_v41 = vmul.f32 %v663_v42, %v1700_v36  ;;  %v666_v24 = vmul.f32 %v663_v42, %v1703_v3  ;;  %v667_v40 = vmul.f32 %v663_v42, %v606_v7  ;;  %v668_v58 = vmul.f32 %v663_v42, %v607_v11 }
 0x437   :  { %v670_v49 = vadd.f32 %v666_v24, %v658_v26  ;;  %v669_v34 = vadd.f32 %v665_v41, %v657_v8  ;;  %v671_v55 = vadd.f32 %v667_v40, %v659_v44  ;;  %v672_v29 = vadd.f32 %v668_v58, %v660_v45 }
 0x494   :  { %v708_v59 = vpop.permute.xlu1 %707  ;;  %v706_v28 = vpop.permute.xlu0 %705 }
 0x495   :  { %v715_v61 = vsel %vm272_vm2, %v706_v28, %v708_v59 }
 0x496   :  { %v718_v7 = vmul.f32 %v715_v61, %v1576_v62 }
 0x498   :  { %v712_v52 = vpop.permute.xlu1 %711  ;;  %v710_v48 = vpop.permute.xlu0 %709  ;;  %v738_v35 = vadd.f32 %v718_v7, %v670_v49 }
 0x499   :  { %v716_v54 = vsel %vm272_vm2, %v712_v52, %v706_v28  ;;  %v714_v36 = vsel %vm272_vm2, %v708_v59, %v710_v48  ;;  %v713_v3 = vsel %vm272_vm2, %v710_v48, %v712_v52  ;;  %v785_v28 = vld [vmem:[#allocation7] sm:$0xff] }
 0x49a   :  { %v717_v11 = vmul.f32 %v716_v54, %v1579_v4  ;;  %v719_v46 = vmul.f32 %v714_v36, %v1586_v21  ;;  %v720_v50 = vmul.f32 %v713_v3, %v1589_v57 }
 0x49c   :  { %v724_v56 = vpop.permute.xlu1 %723  ;;  %v722_v60 = vpop.permute.xlu0 %721  ;;  %v737_v63 = vadd.f32 %v717_v11, %v669_v34  ;;  %v739_v51 = vadd.f32 %v719_v46, %v671_v55  ;;  %v740_v39 = vadd.f32 %v720_v50, %v672_v29 }
 0x49d   :  { %v731_v43 = vsel %vm310_vm3, %v722_v60, %v724_v56 }
 0x49e   :  { %v733_v2 = vmul.f32 %v731_v43, %v1599_v25 }
 0x4a0   :  { %v728_v1 = vpop.permute.xlu1 %727  ;;  %v726_v13 = vpop.permute.xlu0 %725  ;;  %v741_v25 = vadd.f32 %v737_v63, %v733_v2 }
 0x4a1   :  { %v732_v62 = vsel %vm310_vm3, %v728_v1, %v722_v60  ;;  %v729_v4 = vsel %vm310_vm3, %v726_v13, %v728_v1  ;;  %v730_v21 = vsel %vm310_vm3, %v724_v56, %v726_v13 }
 0x4a2   :  { %v736_v15 = vmul.f32 %v732_v62, %v1606_v16  ;;  %v734_v57 = vmul.f32 %v730_v21, %v1609_v5  ;;  %v735_v23 = vmul.f32 %v729_v4, %v1612_v9  ;;  %v745_v31 = vmul.f32 %v741_v25, %v741_v25 }
 0x4a4   :  { %v744_v30 = vadd.f32 %v740_v39, %v736_v15  ;;  %v742_v18 = vadd.f32 %v738_v35, %v734_v57  ;;  %v743_v17 = vadd.f32 %v739_v51, %v735_v23 }
 0x4a6   :  { %v747_v53 = vadd.f32 %v742_v18, %v741_v25  ;;  %v767_v0 = vadd.f32 %v744_v30, %v743_v17  ;;  %v746_v19 = vmul.f32 %v742_v18, %v742_v18  ;;  %v765_v22 = vmul.f32 %v743_v17, %v743_v17 }
 0x4a7   :  { %v766_v10 = vmul.f32 %v744_v30, %v744_v30 }
 0x4a8   :  { %748 = vadd.xlane.f32.xlu0 %v747_v53  ;;  %768 = vadd.xlane.f32.xlu1 %v767_v0  ;;  %v750_v27 = vadd.f32 %v746_v19, %v745_v31 }
 0x4a9   :  { %v770_v37 = vadd.f32 %v766_v10, %v765_v22 }
 0x4ac   :  { %751 = vadd.xlane.f32.xlu0 %v750_v27 }
 0x4b0   :  { %771 = vadd.xlane.f32.xlu0 %v770_v37 }
 0x535   :  { %v749_v16 = vpop.xlane.xlu0 %748  ;;  %v769_v32 = vpop.xlane.xlu1 %768 }
 0x536   :  { %v753_v5 = vmul.f32 0.00390625, %v749_v16  ;;  %v773_v47 = vmul.f32 0.00390625, %v769_v32  ;;  %v971_v32 = vld [vmem:[#allocation8] sm:$0xff] }
 0x538   :  { %v755_v38 = vmul.f32 %v753_v5, %v753_v5  ;;  %v775_v8 = vmul.f32 %v773_v47, %v773_v47  ;;  %v757_v42 = vsub.f32 %v741_v25, %v753_v5  ;;  %v758_v41 = vsub.f32 %v742_v18, %v753_v5 }
 0x539   :  { %v752_v9 = vpop.xlane.xlu0 %751  ;;  %v777_v49 = vsub.f32 %v743_v17, %v773_v47  ;;  %v778_v34 = vsub.f32 %v744_v30, %v773_v47 }
 0x53a   :  { %v754_v14 = vmul.f32 0.00390625, %v752_v9 }
 0x53c   :  { %v756_v12 = vsub.f32 %v754_v14, %v755_v38 }
 0x53d   :  { %v772_v6 = vpop.xlane.xlu0 %771 }
 0x53e   :  { %v759_v20 = vadd.f32 1e-05, %v756_v12  ;;  %v774_v26 = vmul.f32 0.00390625, %v772_v6 }
 0x540   :  { %1197 = vrsqrt.f32 %v759_v20  ;;  %v776_v44 = vsub.f32 %v774_v26, %v775_v8 }
 0x542   :  { %v779_v45 = vadd.f32 1e-05, %v776_v44 }
 0x544   :  { %1199 = vrsqrt.f32 %v779_v45 }
 0x54a   :  { %v1198_v24 = vpop.eup %1197 }
 0x54b   :  { %v762_v40 = vmul.f32 %v1198_v24, %v758_v41  ;;  %v761_v58 = vmul.f32 %v1198_v24, %v757_v42 }
 0x54d   :  { %v764_v55 = vmax.f32 %v762_v40, 0.0  ;;  %v763_v29 = vmax.f32 %v761_v58, 0.0 }
 0x54e   :  { %v1200_v59 = vpop.eup %1199 }
 0x54f   :  { %789 = vmatprep.subr.mxu0 %v764_v55  ;;  %v782_v52 = vmul.f32 %v1200_v59, %v778_v34  ;;  %v781_v48 = vmul.f32 %v1200_v59, %v777_v49 }
 0x550   :  { %790 = vmatpush1.msra.mxu0 %v763_v29 }
 0x551   :  { %1146 = vmatmul.mubr.msk.f32.vlgmr.msra.gmra.mrb[2].mxu0 %vm389_vm4, %v785_v28  ;;  %v784_v61 = vmax.f32 %v782_v52, 0.0  ;;  %v783_v54 = vmax.f32 %v781_v48, 0.0 }
 0x552   :  { %1045 = vmatprep.mubr.f32.mxu0 %v1340_v33 }
 0x553   :  { %860 = vmatprep.subr.mxu1 %v784_v61 }
 0x554   :  { %861 = vmatpush1.msra.mxu1 %v783_v54 }
 0x555   :  { %1147 = vmatmul.mubr.msk.f32.vlgmr.msra.gmra.mrb[2].mxu1 %vm389_vm4, %v785_v28 }
 0x556   :  { %1116 = vmatprep.mubr.f32.mxu1 %v1340_v33  ;;  %v972_v33 = vld [vmem:[%s1801_s7] sm:$0xff]  ;;  %s1341_s7 = smov [#allocation10]  }
 0x557   :  { %s1133_s14 = sshll.u32 %s1341_s7, 4  ;;  %s1134_s14 = int_to_ptr.vmem [resolvable:$true] %s1133_s14 }
 0x558   :  { %s1293_s15 = scalar_lea.vmem %s1134_s14, 512  ;;  %p1298_p5 = scmp.lt.s32.totalorder %s1134_s14, %s1134_s14 }
 0x559   :  { %p1294_p4 = scmp.ne.s32.totalorder %s1134_s14, %s1293_s15  ;;  %p1299_p6 = scmp.lt.s32.totalorder %s1293_s15, %s1293_s15 }
 0x55b   :  { %p1300_p7 = por %p1299_p6, %p1298_p5 }
 0x55d   :  { %p1301_p8 = pnand %p1300_p7, %p1294_p4 }
 0x624   :  { %v855_v36 = vpop.f32.mrb[2].mxu0 }
 0x625   :  { %v857_v3 = vpop.f32.mrb[3].mxu0  ;;  %v931_v7 = vmul.f32 %v855_v36, %v855_v36 }
 0x626   :  { %v933_v11 = vadd.f32 %v857_v3, %v855_v36  ;;  %v932_v56 = vmul.f32 %v857_v3, %v857_v3 }
 0x628   :  { %934 = vadd.xlane.f32.xlu1 %v933_v11  ;;  %v926_v60 = vpop.f32.mrb[2].mxu1  ;;  %v936_v46 = vadd.f32 %v932_v56, %v931_v7 }
 0x629   :  { %v928_v43 = vpop.f32.mrb[3].mxu1  ;;  %v951_v50 = vmul.f32 %v926_v60, %v926_v60 }
 0x62a   :  { %v953_v35 = vadd.f32 %v928_v43, %v926_v60  ;;  %v952_v63 = vmul.f32 %v928_v43, %v928_v43 }
 0x62c   :  { %937 = vadd.xlane.f32.xlu1 %v936_v46  ;;  %954 = vadd.xlane.f32.xlu0 %v953_v35  ;;  %v956_v2 = vadd.f32 %v952_v63, %v951_v50 }
 0x630   :  { %957 = vadd.xlane.f32.xlu0 %v956_v2 }
 0x63d   :  { %975 = vperm.xlu1 %1187, %v972_v33  }
 0x6b5   :  { %v935_v1 = vpop.xlane.xlu1 %934 }
 0x6b6   :  { %v939_v13 = vmul.f32 0.00390625, %v935_v1 }
 0x6b8   :  { %v941_v51 = vmul.f32 %v939_v13, %v939_v13  ;;  %v943_v53 = vsub.f32 %v855_v36, %v939_v13  ;;  %v944_v0 = vsub.f32 %v857_v3, %v939_v13 }
 0x6b9   :  { %v938_v62 = vpop.xlane.xlu1 %937  ;;  %v955_v4 = vpop.xlane.xlu0 %954 }
 0x6ba   :  { %v940_v21 = vmul.f32 0.00390625, %v938_v62  ;;  %v959_v39 = vmul.f32 0.00390625, %v955_v4 }
 0x6bc   :  { %v942_v15 = vsub.f32 %v940_v21, %v941_v51  ;;  %v961_v25 = vmul.f32 %v959_v39, %v959_v39  ;;  %v963_v22 = vsub.f32 %v926_v60, %v959_v39  ;;  %v964_v10 = vsub.f32 %v928_v43, %v959_v39 }
 0x6bd   :  { %v958_v57 = vpop.xlane.xlu0 %957  ;;  %v976_v12 = vpop.permute.xlu1 %975 }
 0x6be   :  { %v945_v23 = vadd.f32 1e-05, %v942_v15  ;;  %v960_v30 = vmul.f32 0.00390625, %v958_v57 }
 0x6c0   :  { %1201 = vrsqrt.f32 %v945_v23  ;;  %v962_v18 = vsub.f32 %v960_v30, %v961_v25 }
 0x6c2   :  { %v965_v17 = vadd.f32 1e-05, %v962_v18 }
 0x6c4   :  { %1203 = vrsqrt.f32 %v965_v17 }
 0x6ca   :  { %v1202_v19 = vpop.eup %1201 }
 0x6cb   :  { %v948_v31 = vmul.f32 %v1202_v19, %v944_v0  ;;  %v947_v27 = vmul.f32 %v1202_v19, %v943_v53 }
 0x6cd   :  { %v950_v37 = vmax.f32 %v948_v31, 0.0  ;;  %v949_v16 = vmax.f32 %v947_v27, 0.0 }
 0x6ce   :  { %v1204_v5 = vpop.eup %1203 }
 0x6cf   :  { %981 = vmatprep.subr.mxu0 %v950_v37  ;;  %v968_v9 = vmul.f32 %v1204_v5, %v964_v10  ;;  %v967_v47 = vmul.f32 %v1204_v5, %v963_v22 }
 0x6d0   :  { %982 = vmatpush1.msra.mxu0 %v949_v16 }
 0x6d1   :  { %v970_v38 = vmax.f32 %v968_v9, 0.0  ;;  %v969_v14 = vmax.f32 %v967_v47, 0.0  ;;  %1148 = vmatmul.mubr.msk.f32.vlgmr.msra.gmra.mrb[4].mxu0 %vm389_vm4, %v971_v32 }
 0x6d3   :  { %1052 = vmatprep.subr.mxu1 %v970_v38 }
 0x6d4   :  { %1053 = vmatpush1.msra.mxu1 %v969_v14 }
 0x6d5   :  { %1149 = vmatmul.mubr.msk.f32.vlgmr.msra.gmra.mrb[4].mxu1 %vm389_vm4, %v971_v32 }
 0x7a4   :  { %v1047_v6 = vpop.f32.mrb[4].mxu0 }
 0x7a5   :  { %v1049_v20 = vpop.f32.mrb[5].mxu0  ;;  %v1048_v8 = vadd.f32 %v1047_v6, %v976_v12 }
 0x7a6   :  { %v1050_v26 = vadd.f32 %v1049_v20, %v976_v12 }
 0x7a7   :  { %1123 = vst [vmem:[#allocation10] sm:$0xff] %v1048_v8 }
 0x7a8   :  { %v1118_v44 = vpop.f32.mrb[4].mxu1  ;;  %1124 = vst [vmem:[#allocation10 + $0x8] sm:$0xff] %v1050_v26 }
 0x7a9   :  { %v1119_v45 = vadd.f32 %v1118_v44, %v976_v12  ;;  %v1120_v42 = vpop.f32.mrb[5].mxu1 }
 0x7aa   :  { %v1121_v41 = vadd.f32 %v1120_v42, %v976_v12 }
 0x7ab   :  { %1125 = vst [vmem:[#allocation10 + $0x10] sm:$0xff] %v1119_v45 }
 0x7ac   :  { %1126 = vst [vmem:[#allocation10 + $0x18] sm:$0xff] %v1121_v41 }
 0x7ad   :  { %1304 = shalt.err (!%p1301_p8)
}
 0x7ae   :  { %s1305_s0 = scalar_lea.hbm %s1802_s8, 512 }
 0x7af   :  { %p1306_p9 = scmp.ne.s32.totalorder %s1802_s8, %s1305_s0  ;;  %p1309_p10 = scmp.lt.u32.totalorder %s1305_s0, %s1802_s8 }
 0x7b1   :  { %p1311_p11 = pnand %p1309_p10, %p1306_p9 }
 0x7b3   :  { %1314 = shalt.err (!%p1311_p11)
}
 0x7b4   :  { %1136 = dma.vmem_to_hbm [thread:$0]  %s1134_s14, 512, %s1802_s8, [#allocation4]  }
 0x7b5   :  { %1321 = dma.done.wait [#allocation4], 512  }
 0x7b6   :  { %1322 = vsyncadd [#allocation4], 4294966784 }
 0x7b7   :  { %1140 = vsyncpa [#allocation3], 1 }
 0x7b8   :  { %1141 = vsyncpa [#allocation6], 1 }
 0x7b9   :  { %1142 = vsyncpa [#allocation9], 1 }
 0x7ba   :  { %1143 = vsyncpa [#allocation4], 1 }

</bundles_post_ra>
